<compile_context>
chip_gen: v5e
topology: v5e:2x2
jax: 0.10.0
libtpu: 0.0.40
codegen_flags: <defaults>
</compile_context>

<pallas_src>
import jax
import jax.numpy as jnp
from jax.experimental import pallas as pl
from jax.experimental.pallas import tpu as pltpu

LANE = 128   # TPU lane width (last-dim tiling unit)


def _round_up(x, m):
    return ((x + m - 1) // m) * m


# ----------------------------------------------------------------------------
# Kernel body: fused 3-layer MLP on one (tile, 512) batch block.
# Matmul operands are in the compute dtype (weights' dtype); accumulation and
# bias-add are f32; output is written in o_ref.dtype (compute dtype).
# ----------------------------------------------------------------------------
def _mlp_kernel(h_ref, w1_ref, b1_ref, w2_ref, b2_ref, w3_ref, b3_ref, o_ref):
    cdt = w1_ref.dtype
    x = h_ref[...].astype(cdt)                       # in-kernel cast (free under MXU)
    z = jnp.dot(x, w1_ref[...], preferred_element_type=jnp.float32) + b1_ref[...]
    x = jnp.maximum(z, 0.0).astype(cdt)
    z = jnp.dot(x, w2_ref[...], preferred_element_type=jnp.float32) + b2_ref[...]
    x = jnp.maximum(z, 0.0).astype(cdt)
    z = jnp.dot(x, w3_ref[...], preferred_element_type=jnp.float32) + b3_ref[...]
    o_ref[...] = z.astype(o_ref.dtype)


# ----------------------------------------------------------------------------
# One-time weight preparation (hoisted out of the per-call hot path).
# Weights are stored [in_features, out_features]  (x @ W + b == PyTorch x@W.T+b).
# ----------------------------------------------------------------------------
def prepare_label_predictor_params(w1, b1, w2, b2, w3, b3,
                                   compute_dtype=jnp.bfloat16):
    d_in, d_hid = w1.shape
    d_out = w3.shape[1]                        # 10
    d_pad = _round_up(max(d_out, LANE), LANE)  # lane-dense 128-wide head

    w3p = jnp.pad(w3, ((0, 0), (0, d_pad - d_out)))
    b3p = jnp.pad(b3, (0, d_pad - d_out))

    params = dict(
        w1=w1.astype(compute_dtype),
        w2=w2.astype(compute_dtype),
        w3=w3p.astype(compute_dtype),
        b1=b1.reshape(1, d_hid).astype(jnp.float32),
        b2=b2.reshape(1, d_hid).astype(jnp.float32),
        b3=b3p.reshape(1, d_pad).astype(jnp.float32),
        d_in=d_in, d_hid=d_hid, d_out=d_out, d_pad=d_pad,
        compute_dtype=jnp.dtype(compute_dtype),
    )
    return params


def _choose_tiling(B, batch_tile, unit):
    """Returns (tile, B_pad). >=2 grid steps whenever B > batch_tile (v7x TCs)."""
    if B <= batch_tile:
        tile = _round_up(max(B, unit), unit)
        return tile, tile
    n_steps = max(2, pl.cdiv(B, batch_tile))
    tile = _round_up(pl.cdiv(B, n_steps), unit)
    return tile, n_steps * tile


# ----------------------------------------------------------------------------
# Forward pass with pre-prepared params (hot path: no weight traffic in XLA).
# ----------------------------------------------------------------------------
def label_predictor_apply(h, params, *, batch_tile=512):
    B, D_in = h.shape
    assert D_in == params["d_in"]
    D_hid, D_out, D_pad = params["d_hid"], params["d_out"], params["d_pad"]
    cdt = params["compute_dtype"]

    # f32 compute path: cap tile at 512 rows (v5e 16 MiB scoped-VMEM default).
    if cdt.itemsize >= 4:
        batch_tile = min(batch_tile, 512)
    unit = 16 if cdt.itemsize < 4 else 8       # bf16 packs 16 rows / sublane group

    tile, B_pad = _choose_tiling(B, batch_tile, unit)
    hp = h if B_pad == B else jnp.pad(h, ((0, B_pad - B), (0, 0)))

    grid = (B_pad // tile,)

    # Grid-invariant weights/biases stay resident in VMEM (no double-buffering).
    resident = pl.BlockSpec(memory_space=pltpu.MemorySpace.VMEM)

    flops = 2 * B_pad * (D_in * D_hid + D_hid * D_hid + D_hid * D_pad)
    w_bytes = (D_in * D_hid + D_hid * D_hid + D_hid * D_pad) * cdt.itemsize
    b_bytes = (2 * D_hid + D_pad) * 4
    io_bytes = B_pad * D_in * hp.dtype.itemsize + B_pad * D_pad * cdt.itemsize
    cost = pl.CostEstimate(flops=flops, transcendentals=0,
                           bytes_accessed=w_bytes + b_bytes + io_bytes)

    out = pl.pallas_call(
        _mlp_kernel,
        out_shape=jax.ShapeDtypeStruct((B_pad, D_pad), cdt),
        grid=grid,
        in_specs=[
            pl.BlockSpec((tile, D_in), lambda i: (i, 0)),   # h: pipelined batch tiles
            resident,                                       # W1
            resident,                                       # b1
            resident,                                       # W2
            resident,                                       # b2
            resident,                                       # W3 (padded to 128 lanes)
            resident,                                       # b3 (padded to 128 lanes)
        ],
        out_specs=pl.BlockSpec((tile, D_pad), lambda i: (i, 0)),
        compiler_params=pltpu.CompilerParams(
            dimension_semantics=("parallel",),   # batch tiles shard across TCs (v7x)
        ),
        cost_estimate=cost,
    )(hp, params["w1"], params["b1"], params["w2"], params["b2"],
      params["w3"], params["b3"])

    return out[:B, :D_out].astype(jnp.float32)


# Convenience one-shot wrapper (prep + apply) matching the old signature.
def label_predictor(h, w1, b1, w2, b2, w3, b3, *, batch_tile=512,
                    compute_dtype=jnp.bfloat16):
    params = prepare_label_predictor_params(w1, b1, w2, b2, w3, b3,
                                            compute_dtype=compute_dtype)
    return label_predictor_apply(h, params, batch_tile=batch_tile)


# ----------------------------------------------------------------------------
# Test / demo
# ----------------------------------------------------------------------------
def _init_linear(key, d_in, d_out):
    # PyTorch-style uniform(-1/sqrt(in), 1/sqrt(in)) init.
    kw, kb = jax.random.split(key)
    bound = 1.0 / (d_in ** 0.5)
    w = jax.random.uniform(kw, (d_in, d_out), jnp.float32, -bound, bound)
    b = jax.random.uniform(kb, (d_out,), jnp.float32, -bound, bound)
    return w, b


def _reference(h, w1, b1, w2, b2, w3, b3):
    x = jnp.maximum(h @ w1 + b1, 0.0)
    x = jnp.maximum(x @ w2 + b2, 0.0)
    return x @ w3 + b3


if __name__ == "__main__":
    key = jax.random.PRNGKey(0)
    k_h, k1, k2, k3 = jax.random.split(key, 4)

    B = 8
    h = jax.random.normal(k_h, (B, 512), jnp.float32)
    w1, b1 = _init_linear(k1, 512, 512)
    w2, b2 = _init_linear(k2, 512, 512)
    w3, b3 = _init_linear(k3, 512, 10)

    ref = _reference(h, w1, b1, w2, b2, w3, b3)

    # Weight prep hoisted out of the hot path: done ONCE per compute dtype.
    params_f32 = prepare_label_predictor_params(w1, b1, w2, b2, w3, b3,
                                                compute_dtype=jnp.float32)
    params_bf16 = prepare_label_predictor_params(w1, b1, w2, b2, w3, b3,
                                                 compute_dtype=jnp.bfloat16)

    # 1) Exact-semantics path (f32 matmuls), small batch -> single grid step.
    out_f32 = jax.block_until_ready(label_predictor_apply(h, params_f32))
    assert out_f32.shape == (B, 10)
    assert jnp.allclose(out_f32, ref, atol=1e-4, rtol=1e-4)

    # 2) Fast default path (bf16 operands + bf16 writeback, f32 accumulation).
    out_bf16 = jax.block_until_ready(label_predictor_apply(h, params_bf16))
    assert out_bf16.shape == (B, 10)
    assert jnp.allclose(out_bf16, ref, atol=5e-2, rtol=5e-2)

    # 3) Larger, non-tile-multiple batch with a small batch_tile: exercises the
    #    ragged tile sizing (tile = round_up(ceil(200/2), 16) = 112) and a
    #    2-step parallel grid (both TensorCores on v7x).
    B2 = 200
    h2 = jax.random.normal(jax.random.PRNGKey(1), (B2, 512), jnp.float32)
    ref2 = _reference(h2, w1, b1, w2, b2, w3, b3)
    out2 = jax.block_until_ready(
        label_predictor_apply(h2, params_bf16, batch_tile=128))
    assert out2.shape == (B2, 10)
    assert jnp.allclose(out2, ref2, atol=5e-2, rtol=5e-2)

    # 4) Large batch on the default tile (512): multi-step grid, MXU-bound.
    B3 = 1024
    h3 = jax.random.normal(jax.random.PRNGKey(2), (B3, 512), jnp.float32)
    ref3 = _reference(h3, w1, b1, w2, b2, w3, b3)
    out3 = jax.block_until_ready(label_predictor_apply(h3, params_bf16))
    assert out3.shape == (B3, 10)
    assert jnp.allclose(out3, ref3, atol=5e-2, rtol=5e-2)

    print("KERNEL_OK")
</pallas_src>

<mosaic_0001>
module attributes {stable_mosaic.version = 11 : i64} {
  func.func @_mlp_kernel(%arg0: i32, %arg1: memref<8x512xf32, #tpu.memory_space<vmem>>, %arg2: memref<512x512xf32, #tpu.memory_space<vmem>>, %arg3: memref<1x512xf32, #tpu.memory_space<vmem>>, %arg4: memref<512x512xf32, #tpu.memory_space<vmem>>, %arg5: memref<1x512xf32, #tpu.memory_space<vmem>>, %arg6: memref<512x128xf32, #tpu.memory_space<vmem>>, %arg7: memref<1x128xf32, #tpu.memory_space<vmem>>, %arg8: memref<8x128xf32, #tpu.memory_space<vmem>>) attributes {dimension_semantics = [#tpu.dimension_semantics<parallel>], iteration_bounds = array<i64: 1>, scalar_prefetch = 0 : i64, scratch_operands = 0 : i64, tpu.core_type = #tpu.core_type<tc>, window_params = [{transform_indices = @transform_0, window_bounds = array<i64: 8, 512>}, {pipeline_mode = #tpu.pipeline_mode<synchronous>, transform_indices = @transform_1, window_bounds = array<i64: 512, 512>}, {pipeline_mode = #tpu.pipeline_mode<synchronous>, transform_indices = @transform_2, window_bounds = array<i64: 1, 512>}, {pipeline_mode = #tpu.pipeline_mode<synchronous>, transform_indices = @transform_3, window_bounds = array<i64: 512, 512>}, {pipeline_mode = #tpu.pipeline_mode<synchronous>, transform_indices = @transform_4, window_bounds = array<i64: 1, 512>}, {pipeline_mode = #tpu.pipeline_mode<synchronous>, transform_indices = @transform_5, window_bounds = array<i64: 512, 128>}, {pipeline_mode = #tpu.pipeline_mode<synchronous>, transform_indices = @transform_6, window_bounds = array<i64: 1, 128>}, {transform_indices = @transform_7, window_bounds = array<i64: 8, 128>}]} {
    %c0 = arith.constant 0 : index
    %c0_0 = arith.constant 0 : index
    %0 = vector.load %arg1[%c0, %c0_0] : memref<8x512xf32, #tpu.memory_space<vmem>>, vector<8x512xf32>
    %c0_1 = arith.constant 0 : index
    %c0_2 = arith.constant 0 : index
    %1 = vector.load %arg2[%c0_1, %c0_2] : memref<512x512xf32, #tpu.memory_space<vmem>>, vector<512x512xf32>
    %cst = arith.constant dense<0.000000e+00> : vector<8x512xf32>
    %2 = tpu.matmul %0, %1, %cst {dimension_numbers = #tpu.dot_dimension_numbers<[1], [0], [0], [1], [0, 0, 1, 1], [], []>} : vector<8x512xf32>, vector<512x512xf32>, vector<8x512xf32> -> vector<8x512xf32>
    %c0_3 = arith.constant 0 : index
    %c0_4 = arith.constant 0 : index
    %3 = vector.load %arg3[%c0_3, %c0_4] : memref<1x512xf32, #tpu.memory_space<vmem>>, vector<1x512xf32>
    %4 = vector.broadcast %3 : vector<1x512xf32> to vector<8x512xf32>
    %5 = arith.addf %2, %4 : vector<8x512xf32>
    %cst_5 = arith.constant 0.000000e+00 : f32
    %6 = vector.broadcast %cst_5 : f32 to vector<8x512xf32>
    %7 = arith.maximumf %5, %6 : vector<8x512xf32>
    %c0_6 = arith.constant 0 : index
    %c0_7 = arith.constant 0 : index
    %8 = vector.load %arg4[%c0_6, %c0_7] : memref<512x512xf32, #tpu.memory_space<vmem>>, vector<512x512xf32>
    %cst_8 = arith.constant dense<0.000000e+00> : vector<8x512xf32>
    %9 = tpu.matmul %7, %8, %cst_8 {dimension_numbers = #tpu.dot_dimension_numbers<[1], [0], [0], [1], [0, 0, 1, 1], [], []>} : vector<8x512xf32>, vector<512x512xf32>, vector<8x512xf32> -> vector<8x512xf32>
    %c0_9 = arith.constant 0 : index
    %c0_10 = arith.constant 0 : index
    %10 = vector.load %arg5[%c0_9, %c0_10] : memref<1x512xf32, #tpu.memory_space<vmem>>, vector<1x512xf32>
    %11 = vector.broadcast %10 : vector<1x512xf32> to vector<8x512xf32>
    %12 = arith.addf %9, %11 : vector<8x512xf32>
    %cst_11 = arith.constant 0.000000e+00 : f32
    %13 = vector.broadcast %cst_11 : f32 to vector<8x512xf32>
    %14 = arith.maximumf %12, %13 : vector<8x512xf32>
    %c0_12 = arith.constant 0 : index
    %c0_13 = arith.constant 0 : index
    %15 = vector.load %arg6[%c0_12, %c0_13] : memref<512x128xf32, #tpu.memory_space<vmem>>, vector<512x128xf32>
    %cst_14 = arith.constant dense<0.000000e+00> : vector<8x128xf32>
    %16 = tpu.matmul %14, %15, %cst_14 {dimension_numbers = #tpu.dot_dimension_numbers<[1], [0], [0], [1], [0, 0, 1, 1], [], []>} : vector<8x512xf32>, vector<512x128xf32>, vector<8x128xf32> -> vector<8x128xf32>
    %c0_15 = arith.constant 0 : index
    %c0_16 = arith.constant 0 : index
    %17 = vector.load %arg7[%c0_15, %c0_16] : memref<1x128xf32, #tpu.memory_space<vmem>>, vector<1x128xf32>
    %18 = vector.broadcast %17 : vector<1x128xf32> to vector<8x128xf32>
    %19 = arith.addf %16, %18 : vector<8x128xf32>
    %c0_17 = arith.constant 0 : index
    %c0_18 = arith.constant 0 : index
    %20 = vector.load %arg8[%c0_17, %c0_18] : memref<8x128xf32, #tpu.memory_space<vmem>>, vector<8x128xf32>
    tpu.vector_store %arg8[%c0_17, %c0_18], %19 {strides = array<i32>} : memref<8x128xf32, #tpu.memory_space<vmem>>, vector<8x128xf32>,
    return
  }
  func.func @transform_0(%arg0: i32) -> (i32, i32) {
    %c0_i32 = arith.constant 0 : i32
    %c0_i32_0 = arith.constant 0 : i32
    return %arg0, %c0_i32 : i32, i32
  }
  func.func @transform_1(%arg0: i32) -> (i32, i32) {
    %c0_i32 = arith.constant 0 : i32
    %c0_i32_0 = arith.constant 0 : i32
    %c0_i32_1 = arith.constant 0 : i32
    return %c0_i32, %c0_i32_0 : i32, i32
  }
  func.func @transform_2(%arg0: i32) -> (i32, i32) {
    %c0_i32 = arith.constant 0 : i32
    %c0_i32_0 = arith.constant 0 : i32
    %c0_i32_1 = arith.constant 0 : i32
    return %c0_i32, %c0_i32_0 : i32, i32
  }
  func.func @transform_3(%arg0: i32) -> (i32, i32) {
    %c0_i32 = arith.constant 0 : i32
    %c0_i32_0 = arith.constant 0 : i32
    %c0_i32_1 = arith.constant 0 : i32
    return %c0_i32, %c0_i32_0 : i32, i32
  }
  func.func @transform_4(%arg0: i32) -> (i32, i32) {
    %c0_i32 = arith.constant 0 : i32
    %c0_i32_0 = arith.constant 0 : i32
    %c0_i32_1 = arith.constant 0 : i32
    return %c0_i32, %c0_i32_0 : i32, i32
  }
  func.func @transform_5(%arg0: i32) -> (i32, i32) {
    %c0_i32 = arith.constant 0 : i32
    %c0_i32_0 = arith.constant 0 : i32
    %c0_i32_1 = arith.constant 0 : i32
    return %c0_i32, %c0_i32_0 : i32, i32
  }
  func.func @transform_6(%arg0: i32) -> (i32, i32) {
    %c0_i32 = arith.constant 0 : i32
    %c0_i32_0 = arith.constant 0 : i32
    %c0_i32_1 = arith.constant 0 : i32
    return %c0_i32, %c0_i32_0 : i32, i32
  }
  func.func @transform_7(%arg0: i32) -> (i32, i32) {
    %c0_i32 = arith.constant 0 : i32
    %c0_i32_0 = arith.constant 0 : i32
    return %arg0, %c0_i32 : i32, i32
  }
}

</mosaic_0001>

<bundles_post_ra>
// kernel: tpu_custom_call.1
= control target key start
LH: loop header
LB: loop body
LE: loop exit
PB: predicated region body
PF: predicated region fallthrough
CT: control target
= control target key end

     0   :  { %12 = vsyncpa [#allocation3], 0  ;;  %s1793_s0 = inlined_call_operand.hbm [shape: f32[8,512], index: 0, kind: input, shape index: {}]   ;;  %s1794_s1 = inlined_call_operand.hbm [shape: f32[512,512], index: 1, kind: input, shape index: {}]   ;;  %s1795_s2 = inlined_call_operand.hbm [shape: f32[1,512], index: 2, kind: input, shape index: {}]   ;;  %s1796_s3 = inlined_call_operand.hbm [shape: f32[512,512], index: 3, kind: input, shape index: {}]   ;;  %s1797_s4 = inlined_call_operand.hbm [shape: f32[1,512], index: 4, kind: input, shape index: {}]   ;;  %s1798_s5 = inlined_call_operand.hbm [shape: f32[512,128], index: 5, kind: input, shape index: {}]   ;;  %s1799_s6 = inlined_call_operand.vmem [shape: f32[1,128], index: 6, kind: input, shape index: {}]   ;;  %s1800_s7 = inlined_call_operand.hbm [shape: f32[8,128], index: 7, kind: output, shape index: {}]  }
   0x1   :  { %13 = vsyncpa [#allocation6], 0 }
   0x2   :  { %14 = vsyncpa [#allocation9], 0 }
   0x3   :  { %15 = vsyncpa [#allocation12], 0  ;;  %s32_s26 = sshll.u32 %s1794_s1, 4  ;;  %s33_s26 = int_to_ptr.hbm [resolvable:$true] %s32_s26 }
   0x4   :  { %16 = vsyncpa [#allocation4], 0  ;;  %s1658_s27 = smov [#allocation5]   ;;  %s56_s8 = sshll.u32 %s1796_s3, 4  ;;  %s57_s8 = int_to_ptr.hbm [resolvable:$true] %s56_s8 }
   0x5   :  { %s34_s28 = sshll.u32 %s1658_s27, 4  ;;  %s1659_s9 = smov 512   ;;  %s35_s28 = int_to_ptr.vmem [resolvable:$true] %s34_s28 }
   0x6   :  { %s1660_s10 = smov 32   ;;  %s1661_s11 = smov [#allocation8]  }
   0x7   :  { %40 = dma.hbm_to_vmem [thread:$0]  %s33_s26, 32768, %s35_s28, [#allocation6], %s1659_s9, %s1659_s9, %s1660_s10  }
   0x8   :  { %s58_s12 = sshll.u32 %s1661_s11, 4  ;;  %s22_s15 = sshll.u32 %s1793_s0, 4  ;;  %s59_s12 = int_to_ptr.vmem [resolvable:$true] %s58_s12  ;;  %s23_s15 = int_to_ptr.hbm [resolvable:$true] %s22_s15 }
   0x9   :  { %64 = dma.hbm_to_vmem [thread:$0]  %s57_s8, 32768, %s59_s12, [#allocation9], %s1659_s9, %s1659_s9, %s1660_s10  }
   0xa   :  { %s46_s17 = sshll.u32 %s1795_s2, 4  ;;  %s1662_s18 = smov [#allocation2]   ;;  %s47_s17 = int_to_ptr.hbm [resolvable:$true] %s46_s17 }
   0xb   :  { %s24_s19 = sshll.u32 %s1662_s18, 4  ;;  %s1663_s3 = smov [#allocation7]   ;;  %s25_s19 = int_to_ptr.vmem [resolvable:$true] %s24_s19 }
   0xc   :  { %27 = dma.hbm_to_vmem [thread:$0]  %s23_s15, 512, %s25_s19, [#allocation3]  }
   0xd   :  { %s48_s20 = sshll.u32 %s1663_s3, 4  ;;  %s70_s23 = sshll.u32 %s1797_s4, 4  ;;  %s49_s20 = int_to_ptr.vmem [resolvable:$true] %s48_s20  ;;  %s71_s23 = int_to_ptr.hbm [resolvable:$true] %s70_s23 }
   0xe   :  { %51 = dma.hbm_to_vmem [thread:$0]  %s47_s17, 64, %s49_s20, [#allocation6]  }
   0xf   :  { %s80_s25 = sshll.u32 %s1798_s5, 4  ;;  %s1664_s26 = smov [#allocation10]   ;;  %s81_s25 = int_to_ptr.hbm [resolvable:$true] %s80_s25 }
  0x10   :  { %s72_s2 = sshll.u32 %s1664_s26, 4  ;;  %s1665_s27 = smov [#allocation11]   ;;  %s73_s2 = int_to_ptr.vmem [resolvable:$true] %s72_s2 }
  0x11   :  { %75 = dma.hbm_to_vmem [thread:$0]  %s71_s23, 64, %s73_s2, [#allocation9]  }
  0x12   :  { %s82_s28 = sshll.u32 %s1665_s27, 4  ;;  %s1666_s29 = smov 128   ;;  %s83_s28 = int_to_ptr.vmem [resolvable:$true] %s82_s28 }
  0x13   :  { %s1667_s30 = smov 8  }
  0x14   :  { %88 = dma.hbm_to_vmem [thread:$0]  %s81_s25, 8192, %s83_s28, [#allocation12], %s1666_s29, %s1666_s29, %s1667_s30  }
  0x15   :  { %1648 = dma.done.wait [#allocation3], 512  }
  0x16   :  { %1649 = vsyncadd [#allocation3], 4294966784 }
  0x17   :  { %1650 = dma.done.wait [#allocation6], 32832  }
  0x18   :  { %1651 = vsyncadd [#allocation6], 4294934464 }
  0x19   :  { %1652 = dma.done.wait [#allocation9], 32832  }
  0x1a   :  { %1653 = vsyncadd [#allocation9], 4294934464 }
  0x1b   :  { %1654 = dma.done.wait [#allocation12], 8192  }
  0x1c   :  { %1655 = vsyncadd [#allocation12], 4294959104  ;;  %v179_v0 = vld [vmem:[#allocation5 + $0x1e0] sm:$0xff]  ;;  %v180_v61 = vld [vmem:[#allocation5 + $0x1e8] sm:$0xff]  ;;  %s1668_s8 = smov [#allocation13]   ;;  %s1455_s12 = sshll.u32 %s1800_s7, 4  ;;  %s1456_s12 = int_to_ptr.hbm [resolvable:$true] %s1455_s12 }
  0x1d   :  { %v307_v1 = vld [vmem:[#allocation5 + $0x5e0] sm:$0xff]  ;;  %385 = vmatpush.msra.mxu0 %v179_v0  ;;  %v308_v62 = vld [vmem:[#allocation5 + $0x5e8] sm:$0xff]  ;;  %s1453_s9 = sshll.u32 %s1668_s8, 4  ;;  %s1454_s9 = int_to_ptr.vmem [resolvable:$true] %s1453_s9 }
  0x1e   :  { %v175_v2 = vld [vmem:[#allocation5 + $0x1c0] sm:$0xff]  ;;  %425 = vmatpush.msra.mxu2 %v307_v1  ;;  %v176_v1 = vld [vmem:[#allocation5 + $0x1c8] sm:$0xff] }
  0x1f   :  { %v303_v3 = vld [vmem:[#allocation5 + $0x5c0] sm:$0xff]  ;;  %386 = vmatpush.msra.mxu0 %v175_v2  ;;  %v304_v2 = vld [vmem:[#allocation5 + $0x5c8] sm:$0xff] }
  0x20   :  { %v371_v4 = vld [vmem:[#allocation5 + $0x7e0] sm:$0xff]  ;;  %426 = vmatpush.msra.mxu2 %v303_v3  ;;  %v372_v3 = vld [vmem:[#allocation5 + $0x7e8] sm:$0xff] }
  0x21   :  { %v171_v5 = vld [vmem:[#allocation5 + $0x1a0] sm:$0xff]  ;;  %445 = vmatpush.msra.mxu3 %v371_v4 }
  0x22   :  { %v243_v6 = vld [vmem:[#allocation5 + $0x3e0] sm:$0xff]  ;;  %387 = vmatpush.msra.mxu0 %v171_v5  ;;  %v172_v5 = vld [vmem:[#allocation5 + $0x1a8] sm:$0xff] }
  0x23   :  { %v299_v7 = vld [vmem:[#allocation5 + $0x5a0] sm:$0xff]  ;;  %405 = vmatpush.msra.mxu1 %v243_v6  ;;  %v244_v6 = vld [vmem:[#allocation5 + $0x3e8] sm:$0xff] }
  0x24   :  { %v367_v8 = vld [vmem:[#allocation5 + $0x7c0] sm:$0xff]  ;;  %427 = vmatpush.msra.mxu2 %v299_v7  ;;  %v300_v7 = vld [vmem:[#allocation5 + $0x5a8] sm:$0xff] }
  0x25   :  { %v239_v9 = vld [vmem:[#allocation5 + $0x3c0] sm:$0xff]  ;;  %446 = vmatpush.msra.mxu3 %v367_v8  ;;  %v368_v8 = vld [vmem:[#allocation5 + $0x7c8] sm:$0xff] }
  0x26   :  { %v167_v10 = vld [vmem:[#allocation5 + $0x180] sm:$0xff]  ;;  %406 = vmatpush.msra.mxu1 %v239_v9  ;;  %v168_v9 = vld [vmem:[#allocation5 + $0x188] sm:$0xff] }
  0x27   :  { %v295_v11 = vld [vmem:[#allocation5 + $0x580] sm:$0xff]  ;;  %388 = vmatpush.msra.mxu0 %v167_v10  ;;  %v240_v10 = vld [vmem:[#allocation5 + $0x3c8] sm:$0xff] }
  0x28   :  { %v363_v12 = vld [vmem:[#allocation5 + $0x7a0] sm:$0xff]  ;;  %428 = vmatpush.msra.mxu2 %v295_v11  ;;  %v296_v11 = vld [vmem:[#allocation5 + $0x588] sm:$0xff] }
  0x29   :  { %v235_v13 = vld [vmem:[#allocation5 + $0x3a0] sm:$0xff]  ;;  %447 = vmatpush.msra.mxu3 %v363_v12  ;;  %v364_v12 = vld [vmem:[#allocation5 + $0x7a8] sm:$0xff] }
  0x2a   :  { %v359_v14 = vld [vmem:[#allocation5 + $0x780] sm:$0xff]  ;;  %407 = vmatpush.msra.mxu1 %v235_v13  ;;  %v164_v13 = vld [vmem:[#allocation5 + $0x168] sm:$0xff] }
  0x2b   :  { %v163_v15 = vld [vmem:[#allocation5 + $0x160] sm:$0xff]  ;;  %448 = vmatpush.msra.mxu3 %v359_v14  ;;  %v236_v14 = vld [vmem:[#allocation5 + $0x3a8] sm:$0xff] }
  0x2c   :  { %v291_v16 = vld [vmem:[#allocation5 + $0x560] sm:$0xff]  ;;  %389 = vmatpush.msra.mxu0 %v163_v15  ;;  %v292_v15 = vld [vmem:[#allocation5 + $0x568] sm:$0xff] }
  0x2d   :  { %v231_v17 = vld [vmem:[#allocation5 + $0x380] sm:$0xff]  ;;  %429 = vmatpush.msra.mxu2 %v291_v16  ;;  %v360_v16 = vld [vmem:[#allocation5 + $0x788] sm:$0xff] }
  0x2e   :  { %v355_v18 = vld [vmem:[#allocation5 + $0x760] sm:$0xff]  ;;  %408 = vmatpush.msra.mxu1 %v231_v17  ;;  %v160_v17 = vld [vmem:[#allocation5 + $0x148] sm:$0xff] }
  0x2f   :  { %v159_v19 = vld [vmem:[#allocation5 + $0x140] sm:$0xff]  ;;  %449 = vmatpush.msra.mxu3 %v355_v18  ;;  %v232_v18 = vld [vmem:[#allocation5 + $0x388] sm:$0xff] }
  0x30   :  { %v287_v20 = vld [vmem:[#allocation5 + $0x540] sm:$0xff]  ;;  %390 = vmatpush.msra.mxu0 %v159_v19  ;;  %v288_v19 = vld [vmem:[#allocation5 + $0x548] sm:$0xff] }
  0x31   :  { %v227_v21 = vld [vmem:[#allocation5 + $0x360] sm:$0xff]  ;;  %430 = vmatpush.msra.mxu2 %v287_v20  ;;  %v356_v20 = vld [vmem:[#allocation5 + $0x768] sm:$0xff] }
  0x32   :  { %v351_v22 = vld [vmem:[#allocation5 + $0x740] sm:$0xff]  ;;  %409 = vmatpush.msra.mxu1 %v227_v21  ;;  %v156_v21 = vld [vmem:[#allocation5 + $0x128] sm:$0xff] }
  0x33   :  { %v155_v23 = vld [vmem:[#allocation5 + $0x120] sm:$0xff]  ;;  %450 = vmatpush.msra.mxu3 %v351_v22  ;;  %v228_v22 = vld [vmem:[#allocation5 + $0x368] sm:$0xff] }
  0x34   :  { %v283_v24 = vld [vmem:[#allocation5 + $0x520] sm:$0xff]  ;;  %391 = vmatpush.msra.mxu0 %v155_v23  ;;  %v284_v23 = vld [vmem:[#allocation5 + $0x528] sm:$0xff] }
  0x35   :  { %v223_v25 = vld [vmem:[#allocation5 + $0x340] sm:$0xff]  ;;  %431 = vmatpush.msra.mxu2 %v283_v24  ;;  %v352_v24 = vld [vmem:[#allocation5 + $0x748] sm:$0xff] }
  0x36   :  { %v347_v26 = vld [vmem:[#allocation5 + $0x720] sm:$0xff]  ;;  %410 = vmatpush.msra.mxu1 %v223_v25  ;;  %v152_v25 = vld [vmem:[#allocation5 + $0x108] sm:$0xff] }
  0x37   :  { %v151_v27 = vld [vmem:[#allocation5 + $0x100] sm:$0xff]  ;;  %451 = vmatpush.msra.mxu3 %v347_v26  ;;  %v224_v26 = vld [vmem:[#allocation5 + $0x348] sm:$0xff] }
  0x38   :  { %v279_v28 = vld [vmem:[#allocation5 + $0x500] sm:$0xff]  ;;  %392 = vmatpush.msra.mxu0 %v151_v27  ;;  %v280_v27 = vld [vmem:[#allocation5 + $0x508] sm:$0xff] }
  0x39   :  { %v219_v29 = vld [vmem:[#allocation5 + $0x320] sm:$0xff]  ;;  %432 = vmatpush.msra.mxu2 %v279_v28  ;;  %v348_v28 = vld [vmem:[#allocation5 + $0x728] sm:$0xff] }
  0x3a   :  { %v343_v30 = vld [vmem:[#allocation5 + $0x700] sm:$0xff]  ;;  %411 = vmatpush.msra.mxu1 %v219_v29  ;;  %v148_v29 = vld [vmem:[#allocation5 + $0xe8] sm:$0xff] }
  0x3b   :  { %v147_v31 = vld [vmem:[#allocation5 + $0xe0] sm:$0xff]  ;;  %452 = vmatpush.msra.mxu3 %v343_v30  ;;  %v220_v30 = vld [vmem:[#allocation5 + $0x328] sm:$0xff] }
  0x3c   :  { %v275_v32 = vld [vmem:[#allocation5 + $0x4e0] sm:$0xff]  ;;  %393 = vmatpush.msra.mxu0 %v147_v31  ;;  %v276_v31 = vld [vmem:[#allocation5 + $0x4e8] sm:$0xff] }
  0x3d   :  { %v215_v33 = vld [vmem:[#allocation5 + $0x300] sm:$0xff]  ;;  %433 = vmatpush.msra.mxu2 %v275_v32  ;;  %v344_v32 = vld [vmem:[#allocation5 + $0x708] sm:$0xff] }
  0x3e   :  { %v339_v34 = vld [vmem:[#allocation5 + $0x6e0] sm:$0xff]  ;;  %412 = vmatpush.msra.mxu1 %v215_v33  ;;  %v1727_v33 = vld [vmem:[#allocation2 + $0x10] sm:$0xff] }
  0x3f   :  { %v143_v35 = vld [vmem:[#allocation5 + $0xc0] sm:$0xff]  ;;  %453 = vmatpush.msra.mxu3 %v339_v34  ;;  %v144_v34 = vld [vmem:[#allocation5 + $0xc8] sm:$0xff] }
  0x40   :  { %v271_v36 = vld [vmem:[#allocation5 + $0x4c0] sm:$0xff]  ;;  %394 = vmatpush.msra.mxu0 %v143_v35  ;;  %v216_v35 = vld [vmem:[#allocation5 + $0x308] sm:$0xff] }
  0x41   :  { %v211_v37 = vld [vmem:[#allocation5 + $0x2e0] sm:$0xff]  ;;  %434 = vmatpush.msra.mxu2 %v271_v36  ;;  %v272_v36 = vld [vmem:[#allocation5 + $0x4c8] sm:$0xff] }
  0x42   :  { %v335_v38 = vld [vmem:[#allocation5 + $0x6c0] sm:$0xff]  ;;  %413 = vmatpush.msra.mxu1 %v211_v37  ;;  %v340_v37 = vld [vmem:[#allocation5 + $0x6e8] sm:$0xff] }
  0x43   :  { %v139_v39 = vld [vmem:[#allocation5 + $0xa0] sm:$0xff]  ;;  %454 = vmatpush.msra.mxu3 %v335_v38 }
  0x44   :  { %v267_v40 = vld [vmem:[#allocation5 + $0x4a0] sm:$0xff]  ;;  %395 = vmatpush.msra.mxu0 %v139_v39  ;;  %v1732_v39 = vld [vmem:[#allocation2 + $0x18] sm:$0xff] }
  0x45   :  { %v207_v41 = vld [vmem:[#allocation5 + $0x2c0] sm:$0xff]  ;;  %435 = vmatpush.msra.mxu2 %v267_v40  ;;  %v140_v40 = vld [vmem:[#allocation5 + $0xa8] sm:$0xff] }
  0x46   :  { %v331_v42 = vld [vmem:[#allocation5 + $0x6a0] sm:$0xff]  ;;  %414 = vmatpush.msra.mxu1 %v207_v41  ;;  %v212_v41 = vld [vmem:[#allocation5 + $0x2e8] sm:$0xff] }
  0x47   :  { %v135_v43 = vld [vmem:[#allocation5 + $0x80] sm:$0xff]  ;;  %455 = vmatpush.msra.mxu3 %v331_v42  ;;  %v268_v42 = vld [vmem:[#allocation5 + $0x4a8] sm:$0xff] }
  0x48   :  { %v263_v44 = vld [vmem:[#allocation5 + $0x480] sm:$0xff]  ;;  %396 = vmatpush.msra.mxu0 %v135_v43  ;;  %v336_v43 = vld [vmem:[#allocation5 + $0x6c8] sm:$0xff] }
  0x49   :  { %v203_v45 = vld [vmem:[#allocation5 + $0x2a0] sm:$0xff]  ;;  %436 = vmatpush.msra.mxu2 %v263_v44  ;;  %v1735_v44 = vld [vmem:[#allocation2 + $0x8] sm:$0xff] }
  0x4a   :  { %v327_v46 = vld [vmem:[#allocation5 + $0x680] sm:$0xff]  ;;  %415 = vmatpush.msra.mxu1 %v203_v45  ;;  %v136_v45 = vld [vmem:[#allocation5 + $0x88] sm:$0xff] }
  0x4b   :  { %v131_v47 = vld [vmem:[#allocation5 + $0x60] sm:$0xff]  ;;  %456 = vmatpush.msra.mxu3 %v327_v46  ;;  %v208_v46 = vld [vmem:[#allocation5 + $0x2c8] sm:$0xff] }
  0x4c   :  { %v259_v48 = vld [vmem:[#allocation5 + $0x460] sm:$0xff]  ;;  %397 = vmatpush.msra.mxu0 %v131_v47  ;;  %v264_v47 = vld [vmem:[#allocation5 + $0x488] sm:$0xff] }
  0x4d   :  { %v199_v49 = vld [vmem:[#allocation5 + $0x280] sm:$0xff]  ;;  %437 = vmatpush.msra.mxu2 %v259_v48  ;;  %v332_v48 = vld [vmem:[#allocation5 + $0x6a8] sm:$0xff] }
  0x4e   :  { %v323_v50 = vld [vmem:[#allocation5 + $0x660] sm:$0xff]  ;;  %416 = vmatpush.msra.mxu1 %v199_v49  ;;  %v132_v49 = vld [vmem:[#allocation5 + $0x68] sm:$0xff] }
  0x4f   :  { %v127_v51 = vld [vmem:[#allocation5 + $0x40] sm:$0xff]  ;;  %457 = vmatpush.msra.mxu3 %v323_v50  ;;  %v204_v50 = vld [vmem:[#allocation5 + $0x2a8] sm:$0xff] }
  0x50   :  { %v255_v52 = vld [vmem:[#allocation5 + $0x440] sm:$0xff]  ;;  %398 = vmatpush.msra.mxu0 %v127_v51  ;;  %v260_v51 = vld [vmem:[#allocation5 + $0x468] sm:$0xff] }
  0x51   :  { %v195_v53 = vld [vmem:[#allocation5 + $0x260] sm:$0xff]  ;;  %438 = vmatpush.msra.mxu2 %v255_v52  ;;  %v328_v52 = vld [vmem:[#allocation5 + $0x688] sm:$0xff] }
  0x52   :  { %v319_v54 = vld [vmem:[#allocation5 + $0x640] sm:$0xff]  ;;  %417 = vmatpush.msra.mxu1 %v195_v53  ;;  %v128_v53 = vld [vmem:[#allocation5 + $0x48] sm:$0xff] }
  0x53   :  { %v123_v55 = vld [vmem:[#allocation5 + $0x20] sm:$0xff]  ;;  %458 = vmatpush.msra.mxu3 %v319_v54  ;;  %v200_v54 = vld [vmem:[#allocation5 + $0x288] sm:$0xff] }
  0x54   :  { %v251_v56 = vld [vmem:[#allocation5 + $0x420] sm:$0xff]  ;;  %399 = vmatpush.msra.mxu0 %v123_v55  ;;  %v256_v55 = vld [vmem:[#allocation5 + $0x448] sm:$0xff] }
  0x55   :  { %v191_v57 = vld [vmem:[#allocation5 + $0x240] sm:$0xff]  ;;  %439 = vmatpush.msra.mxu2 %v251_v56  ;;  %v324_v56 = vld [vmem:[#allocation5 + $0x668] sm:$0xff] }
  0x56   :  { %v315_v58 = vld [vmem:[#allocation5 + $0x620] sm:$0xff]  ;;  %418 = vmatpush.msra.mxu1 %v191_v57  ;;  %v124_v57 = vld [vmem:[#allocation5 + $0x28] sm:$0xff] }
  0x57   :  { %v119_v59 = vld [vmem:[#allocation5] sm:$0xff]  ;;  %459 = vmatpush.msra.mxu3 %v315_v58  ;;  %v196_v58 = vld [vmem:[#allocation5 + $0x268] sm:$0xff] }
  0x58   :  { %v247_v60 = vld [vmem:[#allocation5 + $0x400] sm:$0xff]  ;;  %400 = vmatpush.msra.mxu0 %v119_v59  ;;  %v252_v59 = vld [vmem:[#allocation5 + $0x428] sm:$0xff] }
  0x59   :  { %v187_v63 = vld [vmem:[#allocation5 + $0x220] sm:$0xff]  ;;  %440 = vmatpush.msra.mxu2 %v247_v60  ;;  %v320_v60 = vld [vmem:[#allocation5 + $0x648] sm:$0xff] }
  0x5a   :  { %v311_v0 = vld [vmem:[#allocation5 + $0x600] sm:$0xff]  ;;  %465 = vmatpush.msrb.mxu0 %v180_v61  ;;  %419 = vmatpush.msra.mxu1 %v187_v63  ;;  %v120_v61 = vld [vmem:[#allocation5 + $0x8] sm:$0xff] }
  0x5b   :  { %505 = vmatpush.msrb.mxu2 %v308_v62  ;;  %v183_v4 = vld [vmem:[#allocation5 + $0x200] sm:$0xff]  ;;  %460 = vmatpush.msra.mxu3 %v311_v0  ;;  %v192_v62 = vld [vmem:[#allocation5 + $0x248] sm:$0xff] }
  0x5c   :  { %466 = vmatpush.msrb.mxu0 %v176_v1  ;;  %420 = vmatpush.msra.mxu1 %v183_v4  ;;  %v1729_v38 = vld [vmem:[#allocation2] sm:$0xff]  ;;  %v248_v63 = vld [vmem:[#allocation5 + $0x408] sm:$0xff]  ;;  %v181_v1 = vld [vmem:[#allocation5 + $0x1f0] sm:$0xff] }
  0x5d   :  { %506 = vmatpush.msrb.mxu2 %v304_v2  ;;  %525 = vmatpush.msrb.mxu3 %v372_v3  ;;  %v316_v0 = vld [vmem:[#allocation5 + $0x628] sm:$0xff]  ;;  %v309_v2 = vld [vmem:[#allocation5 + $0x5f0] sm:$0xff] }
  0x5e   :  { %467 = vmatpush.msrb.mxu0 %v172_v5  ;;  %485 = vmatpush.msrb.mxu1 %v244_v6  ;;  %v188_v3 = vld [vmem:[#allocation5 + $0x228] sm:$0xff]  ;;  %v177_v5 = vld [vmem:[#allocation5 + $0x1d0] sm:$0xff] }
  0x5f   :  { %507 = vmatpush.msrb.mxu2 %v300_v7  ;;  %526 = vmatpush.msrb.mxu3 %v368_v8  ;;  %v312_v4 = vld [vmem:[#allocation5 + $0x608] sm:$0xff]  ;;  %v305_v6 = vld [vmem:[#allocation5 + $0x5d0] sm:$0xff] }
  0x60   :  { %468 = vmatpush.msrb.mxu0 %v168_v9  ;;  %486 = vmatpush.msrb.mxu1 %v240_v10  ;;  %v373_v7 = vld [vmem:[#allocation5 + $0x7f0] sm:$0xff]  ;;  %v184_v8 = vld [vmem:[#allocation5 + $0x208] sm:$0xff] }
  0x61   :  { %508 = vmatpush.msrb.mxu2 %v296_v11  ;;  %527 = vmatpush.msrb.mxu3 %v364_v12  ;;  %v173_v9 = vld [vmem:[#allocation5 + $0x1b0] sm:$0xff] }
  0x62   :  { %469 = vmatpush.msrb.mxu0 %v164_v13  ;;  %487 = vmatpush.msrb.mxu1 %v236_v14  ;;  %v301_v10 = vld [vmem:[#allocation5 + $0x5b0] sm:$0xff] }
  0x63   :  { %509 = vmatpush.msrb.mxu2 %v292_v15  ;;  %528 = vmatpush.msrb.mxu3 %v360_v16  ;;  %v245_v11 = vld [vmem:[#allocation5 + $0x3f0] sm:$0xff] }
  0x64   :  { %470 = vmatpush.msrb.mxu0 %v160_v17  ;;  %488 = vmatpush.msrb.mxu1 %v232_v18  ;;  %v369_v12 = vld [vmem:[#allocation5 + $0x7d0] sm:$0xff] }
  0x65   :  { %510 = vmatpush.msrb.mxu2 %v288_v19  ;;  %529 = vmatpush.msrb.mxu3 %v356_v20  ;;  %v169_v13 = vld [vmem:[#allocation5 + $0x190] sm:$0xff] }
  0x66   :  { %471 = vmatpush.msrb.mxu0 %v156_v21  ;;  %489 = vmatpush.msrb.mxu1 %v228_v22  ;;  %v297_v14 = vld [vmem:[#allocation5 + $0x590] sm:$0xff] }
  0x67   :  { %511 = vmatpush.msrb.mxu2 %v284_v23  ;;  %530 = vmatpush.msrb.mxu3 %v352_v24  ;;  %v241_v15 = vld [vmem:[#allocation5 + $0x3d0] sm:$0xff] }
  0x68   :  { %472 = vmatpush.msrb.mxu0 %v152_v25  ;;  %490 = vmatpush.msrb.mxu1 %v224_v26  ;;  %v365_v16 = vld [vmem:[#allocation5 + $0x7b0] sm:$0xff] }
  0x69   :  { %512 = vmatpush.msrb.mxu2 %v280_v27  ;;  %531 = vmatpush.msrb.mxu3 %v348_v28  ;;  %v165_v17 = vld [vmem:[#allocation5 + $0x170] sm:$0xff] }
  0x6a   :  { %473 = vmatpush.msrb.mxu0 %v148_v29  ;;  %491 = vmatpush.msrb.mxu1 %v220_v30  ;;  %v293_v18 = vld [vmem:[#allocation5 + $0x570] sm:$0xff] }
  0x6b   :  { %513 = vmatpush.msrb.mxu2 %v276_v31  ;;  %532 = vmatpush.msrb.mxu3 %v344_v32  ;;  %v237_v19 = vld [vmem:[#allocation5 + $0x3b0] sm:$0xff] }
  0x6c   :  { %441 = vmatmul.f32.vlgmr.msra.gmra.mxu2 %v1727_v33  ;;  %474 = vmatpush.msrb.mxu0 %v144_v34  ;;  %v361_v20 = vld [vmem:[#allocation5 + $0x790] sm:$0xff] }
  0x6d   :  { %492 = vmatpush.msrb.mxu1 %v216_v35  ;;  %514 = vmatpush.msrb.mxu2 %v272_v36  ;;  %v161_v21 = vld [vmem:[#allocation5 + $0x150] sm:$0xff] }
  0x6e   :  { %533 = vmatpush.msrb.mxu3 %v340_v37  ;;  %401 = vmatmul.f32.vlgmr.msra.gmra.mxu0 %v1729_v38  ;;  %v289_v22 = vld [vmem:[#allocation5 + $0x550] sm:$0xff] }
  0x6f   :  { %461 = vmatmul.f32.vlgmr.msra.gmra.mxu3 %v1732_v39  ;;  %475 = vmatpush.msrb.mxu0 %v140_v40  ;;  %v233_v23 = vld [vmem:[#allocation5 + $0x390] sm:$0xff] }
  0x70   :  { %493 = vmatpush.msrb.mxu1 %v212_v41  ;;  %515 = vmatpush.msrb.mxu2 %v268_v42  ;;  %v357_v24 = vld [vmem:[#allocation5 + $0x770] sm:$0xff] }
  0x71   :  { %534 = vmatpush.msrb.mxu3 %v336_v43  ;;  %421 = vmatmul.f32.vlgmr.msra.gmra.mxu1 %v1735_v44  ;;  %v157_v25 = vld [vmem:[#allocation5 + $0x130] sm:$0xff] }
  0x72   :  { %476 = vmatpush.msrb.mxu0 %v136_v45  ;;  %494 = vmatpush.msrb.mxu1 %v208_v46  ;;  %v285_v26 = vld [vmem:[#allocation5 + $0x530] sm:$0xff] }
  0x73   :  { %516 = vmatpush.msrb.mxu2 %v264_v47  ;;  %535 = vmatpush.msrb.mxu3 %v332_v48  ;;  %v229_v27 = vld [vmem:[#allocation5 + $0x370] sm:$0xff] }
  0x74   :  { %477 = vmatpush.msrb.mxu0 %v132_v49  ;;  %495 = vmatpush.msrb.mxu1 %v204_v50  ;;  %v353_v28 = vld [vmem:[#allocation5 + $0x750] sm:$0xff] }
  0x75   :  { %517 = vmatpush.msrb.mxu2 %v260_v51  ;;  %536 = vmatpush.msrb.mxu3 %v328_v52  ;;  %v153_v29 = vld [vmem:[#allocation5 + $0x110] sm:$0xff] }
  0x76   :  { %478 = vmatpush.msrb.mxu0 %v128_v53  ;;  %496 = vmatpush.msrb.mxu1 %v200_v54  ;;  %v281_v30 = vld [vmem:[#allocation5 + $0x510] sm:$0xff] }
  0x77   :  { %518 = vmatpush.msrb.mxu2 %v256_v55  ;;  %537 = vmatpush.msrb.mxu3 %v324_v56  ;;  %v225_v31 = vld [vmem:[#allocation5 + $0x350] sm:$0xff] }
  0x78   :  { %479 = vmatpush.msrb.mxu0 %v124_v57  ;;  %497 = vmatpush.msrb.mxu1 %v196_v58  ;;  %v349_v32 = vld [vmem:[#allocation5 + $0x730] sm:$0xff] }
  0x79   :  { %519 = vmatpush.msrb.mxu2 %v252_v59  ;;  %538 = vmatpush.msrb.mxu3 %v320_v60  ;;  %v149_v34 = vld [vmem:[#allocation5 + $0xf0] sm:$0xff] }
  0x7a   :  { %480 = vmatpush.msrb.mxu0 %v120_v61  ;;  %498 = vmatpush.msrb.mxu1 %v192_v62  ;;  %v277_v35 = vld [vmem:[#allocation5 + $0x4f0] sm:$0xff] }
  0x7b   :  { %520 = vmatpush.msrb.mxu2 %v248_v63  ;;  %539 = vmatpush.msrb.mxu3 %v316_v0  ;;  %v221_v36 = vld [vmem:[#allocation5 + $0x330] sm:$0xff] }
  0x7c   :  { %521 = vmatmul.f32.vlgmr.msrb.gmra.mxu2 %v1727_v33  ;;  %545 = vmatpush.msra.mxu0 %v181_v1  ;;  %v345_v37 = vld [vmem:[#allocation5 + $0x710] sm:$0xff] }
  0x7d   :  { %585 = vmatpush.msra.mxu2 %v309_v2  ;;  %499 = vmatpush.msrb.mxu1 %v188_v3  ;;  %v145_v40 = vld [vmem:[#allocation5 + $0xd0] sm:$0xff] }
  0x7e   :  { %540 = vmatpush.msrb.mxu3 %v312_v4  ;;  %481 = vmatmul.f32.vlgmr.msrb.gmra.mxu0 %v1729_v38  ;;  %v273_v41 = vld [vmem:[#allocation5 + $0x4d0] sm:$0xff] }
  0x7f   :  { %541 = vmatmul.f32.vlgmr.msrb.gmra.mxu3 %v1732_v39  ;;  %546 = vmatpush.msra.mxu0 %v177_v5  ;;  %v217_v42 = vld [vmem:[#allocation5 + $0x310] sm:$0xff]  ;;  %v182_v5 = vld [vmem:[#allocation5 + $0x1f8] sm:$0xff] }
  0x80   :  { %586 = vmatpush.msra.mxu2 %v305_v6  ;;  %605 = vmatpush.msra.mxu3 %v373_v7  ;;  %v341_v43 = vld [vmem:[#allocation5 + $0x6f0] sm:$0xff]  ;;  %v310_v6 = vld [vmem:[#allocation5 + $0x5f8] sm:$0xff] }
  0x81   :  { %500 = vmatpush.msrb.mxu1 %v184_v8  ;;  %547 = vmatpush.msra.mxu0 %v173_v9  ;;  %v141_v45 = vld [vmem:[#allocation5 + $0xb0] sm:$0xff]  ;;  %v178_v9 = vld [vmem:[#allocation5 + $0x1d8] sm:$0xff] }
  0x82   :  { %501 = vmatmul.f32.vlgmr.msrb.gmra.mxu1 %v1735_v44  ;;  %587 = vmatpush.msra.mxu2 %v301_v10  ;;  %v269_v46 = vld [vmem:[#allocation5 + $0x4b0] sm:$0xff]  ;;  %v306_v10 = vld [vmem:[#allocation5 + $0x5d8] sm:$0xff] }
  0x83   :  { %565 = vmatpush.msra.mxu1 %v245_v11  ;;  %606 = vmatpush.msra.mxu3 %v369_v12  ;;  %v213_v47 = vld [vmem:[#allocation5 + $0x2f0] sm:$0xff]  ;;  %v374_v11 = vld [vmem:[#allocation5 + $0x7f8] sm:$0xff] }
  0x84   :  { %548 = vmatpush.msra.mxu0 %v169_v13  ;;  %588 = vmatpush.msra.mxu2 %v297_v14  ;;  %v337_v48 = vld [vmem:[#allocation5 + $0x6d0] sm:$0xff]  ;;  %v174_v13 = vld [vmem:[#allocation5 + $0x1b8] sm:$0xff] }
  0x85   :  { %566 = vmatpush.msra.mxu1 %v241_v15  ;;  %607 = vmatpush.msra.mxu3 %v365_v16  ;;  %v137_v49 = vld [vmem:[#allocation5 + $0x90] sm:$0xff]  ;;  %v302_v14 = vld [vmem:[#allocation5 + $0x5b8] sm:$0xff] }
  0x86   :  { %549 = vmatpush.msra.mxu0 %v165_v17  ;;  %589 = vmatpush.msra.mxu2 %v293_v18  ;;  %v265_v50 = vld [vmem:[#allocation5 + $0x490] sm:$0xff]  ;;  %v246_v15 = vld [vmem:[#allocation5 + $0x3f8] sm:$0xff] }
  0x87   :  { %567 = vmatpush.msra.mxu1 %v237_v19  ;;  %608 = vmatpush.msra.mxu3 %v361_v20  ;;  %v209_v51 = vld [vmem:[#allocation5 + $0x2d0] sm:$0xff]  ;;  %v370_v16 = vld [vmem:[#allocation5 + $0x7d8] sm:$0xff] }
  0x88   :  { %550 = vmatpush.msra.mxu0 %v161_v21  ;;  %590 = vmatpush.msra.mxu2 %v289_v22  ;;  %v333_v52 = vld [vmem:[#allocation5 + $0x6b0] sm:$0xff]  ;;  %v170_v17 = vld [vmem:[#allocation5 + $0x198] sm:$0xff] }
  0x89   :  { %568 = vmatpush.msra.mxu1 %v233_v23  ;;  %609 = vmatpush.msra.mxu3 %v357_v24  ;;  %v133_v53 = vld [vmem:[#allocation5 + $0x70] sm:$0xff]  ;;  %v298_v18 = vld [vmem:[#allocation5 + $0x598] sm:$0xff] }
  0x8a   :  { %551 = vmatpush.msra.mxu0 %v157_v25  ;;  %591 = vmatpush.msra.mxu2 %v285_v26  ;;  %v261_v54 = vld [vmem:[#allocation5 + $0x470] sm:$0xff]  ;;  %v242_v19 = vld [vmem:[#allocation5 + $0x3d8] sm:$0xff] }
  0x8b   :  { %569 = vmatpush.msra.mxu1 %v229_v27  ;;  %610 = vmatpush.msra.mxu3 %v353_v28  ;;  %v205_v55 = vld [vmem:[#allocation5 + $0x2b0] sm:$0xff]  ;;  %v366_v20 = vld [vmem:[#allocation5 + $0x7b8] sm:$0xff] }
  0x8c   :  { %552 = vmatpush.msra.mxu0 %v153_v29  ;;  %592 = vmatpush.msra.mxu2 %v281_v30  ;;  %v329_v56 = vld [vmem:[#allocation5 + $0x690] sm:$0xff]  ;;  %v166_v21 = vld [vmem:[#allocation5 + $0x178] sm:$0xff] }
  0x8d   :  { %570 = vmatpush.msra.mxu1 %v225_v31  ;;  %611 = vmatpush.msra.mxu3 %v349_v32  ;;  %v129_v57 = vld [vmem:[#allocation5 + $0x50] sm:$0xff]  ;;  %v294_v22 = vld [vmem:[#allocation5 + $0x578] sm:$0xff] }
  0x8e   :  { %553 = vmatpush.msra.mxu0 %v149_v34  ;;  %593 = vmatpush.msra.mxu2 %v277_v35  ;;  %v257_v58 = vld [vmem:[#allocation5 + $0x450] sm:$0xff]  ;;  %v238_v23 = vld [vmem:[#allocation5 + $0x3b8] sm:$0xff] }
  0x8f   :  { %571 = vmatpush.msra.mxu1 %v221_v36  ;;  %612 = vmatpush.msra.mxu3 %v345_v37  ;;  %v201_v59 = vld [vmem:[#allocation5 + $0x290] sm:$0xff]  ;;  %v362_v24 = vld [vmem:[#allocation5 + $0x798] sm:$0xff] }
  0x90   :  { %554 = vmatpush.msra.mxu0 %v145_v40  ;;  %594 = vmatpush.msra.mxu2 %v273_v41  ;;  %v325_v60 = vld [vmem:[#allocation5 + $0x670] sm:$0xff]  ;;  %v162_v25 = vld [vmem:[#allocation5 + $0x158] sm:$0xff] }
  0x91   :  { %572 = vmatpush.msra.mxu1 %v217_v42  ;;  %613 = vmatpush.msra.mxu3 %v341_v43  ;;  %v125_v61 = vld [vmem:[#allocation5 + $0x30] sm:$0xff]  ;;  %v290_v26 = vld [vmem:[#allocation5 + $0x558] sm:$0xff] }
  0x92   :  { %555 = vmatpush.msra.mxu0 %v141_v45  ;;  %595 = vmatpush.msra.mxu2 %v269_v46  ;;  %v253_v62 = vld [vmem:[#allocation5 + $0x430] sm:$0xff]  ;;  %v234_v27 = vld [vmem:[#allocation5 + $0x398] sm:$0xff] }
  0x93   :  { %573 = vmatpush.msra.mxu1 %v213_v47  ;;  %614 = vmatpush.msra.mxu3 %v337_v48  ;;  %v197_v63 = vld [vmem:[#allocation5 + $0x270] sm:$0xff]  ;;  %v358_v28 = vld [vmem:[#allocation5 + $0x778] sm:$0xff] }
  0x94   :  { %556 = vmatpush.msra.mxu0 %v137_v49  ;;  %596 = vmatpush.msra.mxu2 %v265_v50  ;;  %v321_v0 = vld [vmem:[#allocation5 + $0x650] sm:$0xff]  ;;  %v158_v29 = vld [vmem:[#allocation5 + $0x138] sm:$0xff] }
  0x95   :  { %574 = vmatpush.msra.mxu1 %v209_v51  ;;  %615 = vmatpush.msra.mxu3 %v333_v52  ;;  %v121_v1 = vld [vmem:[#allocation5 + $0x10] sm:$0xff]  ;;  %v286_v30 = vld [vmem:[#allocation5 + $0x538] sm:$0xff] }
  0x96   :  { %557 = vmatpush.msra.mxu0 %v133_v53  ;;  %597 = vmatpush.msra.mxu2 %v261_v54  ;;  %v249_v2 = vld [vmem:[#allocation5 + $0x410] sm:$0xff]  ;;  %v230_v31 = vld [vmem:[#allocation5 + $0x378] sm:$0xff] }
  0x97   :  { %575 = vmatpush.msra.mxu1 %v205_v55  ;;  %616 = vmatpush.msra.mxu3 %v329_v56  ;;  %v193_v3 = vld [vmem:[#allocation5 + $0x250] sm:$0xff]  ;;  %v354_v32 = vld [vmem:[#allocation5 + $0x758] sm:$0xff] }
  0x98   :  { %558 = vmatpush.msra.mxu0 %v129_v57  ;;  %598 = vmatpush.msra.mxu2 %v257_v58  ;;  %v317_v4 = vld [vmem:[#allocation5 + $0x630] sm:$0xff]  ;;  %v154_v34 = vld [vmem:[#allocation5 + $0x118] sm:$0xff] }
  0x99   :  { %576 = vmatpush.msra.mxu1 %v201_v59  ;;  %617 = vmatpush.msra.mxu3 %v325_v60  ;;  %v189_v7 = vld [vmem:[#allocation5 + $0x230] sm:$0xff]  ;;  %v282_v35 = vld [vmem:[#allocation5 + $0x518] sm:$0xff] }
  0x9a   :  { %559 = vmatpush.msra.mxu0 %v125_v61  ;;  %599 = vmatpush.msra.mxu2 %v253_v62  ;;  %v313_v8 = vld [vmem:[#allocation5 + $0x610] sm:$0xff]  ;;  %v226_v36 = vld [vmem:[#allocation5 + $0x358] sm:$0xff] }
  0x9b   :  { %577 = vmatpush.msra.mxu1 %v197_v63  ;;  %618 = vmatpush.msra.mxu3 %v321_v0  ;;  %v185_v12 = vld [vmem:[#allocation5 + $0x210] sm:$0xff]  ;;  %v350_v37 = vld [vmem:[#allocation5 + $0x738] sm:$0xff] }
  0x9c   :  { %560 = vmatpush.msra.mxu0 %v121_v1  ;;  %600 = vmatpush.msra.mxu2 %v249_v2  ;;  %v150_v40 = vld [vmem:[#allocation5 + $0xf8] sm:$0xff] }
  0x9d   :  { %578 = vmatpush.msra.mxu1 %v193_v3  ;;  %619 = vmatpush.msra.mxu3 %v317_v4  ;;  %v278_v41 = vld [vmem:[#allocation5 + $0x4f8] sm:$0xff] }
  0x9e   :  { %601 = vmatmul.f32.vlgmr.msra.gmra.mxu2 %v1727_v33  ;;  %625 = vmatpush.msrb.mxu0 %v182_v5  ;;  %v222_v42 = vld [vmem:[#allocation5 + $0x338] sm:$0xff] }
  0x9f   :  { %665 = vmatpush.msrb.mxu2 %v310_v6  ;;  %579 = vmatpush.msra.mxu1 %v189_v7  ;;  %v346_v43 = vld [vmem:[#allocation5 + $0x718] sm:$0xff] }
  0xa0   :  { %620 = vmatpush.msra.mxu3 %v313_v8  ;;  %561 = vmatmul.f32.vlgmr.msra.gmra.mxu0 %v1729_v38  ;;  %v146_v45 = vld [vmem:[#allocation5 + $0xd8] sm:$0xff] }
  0xa1   :  { %621 = vmatmul.f32.vlgmr.msra.gmra.mxu3 %v1732_v39  ;;  %626 = vmatpush.msrb.mxu0 %v178_v9  ;;  %v274_v46 = vld [vmem:[#allocation5 + $0x4d8] sm:$0xff]  ;;  %v769_v9 = vld [vmem:[#allocation8 + $0x1e0] sm:$0xff] }
  0xa2   :  { %666 = vmatpush.msrb.mxu2 %v306_v10  ;;  %685 = vmatpush.msrb.mxu3 %v374_v11  ;;  %v218_v47 = vld [vmem:[#allocation5 + $0x318] sm:$0xff] }
  0xa3   :  { %580 = vmatpush.msra.mxu1 %v185_v12  ;;  %627 = vmatpush.msrb.mxu0 %v174_v13  ;;  %v342_v48 = vld [vmem:[#allocation5 + $0x6f8] sm:$0xff]  ;;  %v765_v12 = vld [vmem:[#allocation8 + $0x1c0] sm:$0xff] }
  0xa4   :  { %581 = vmatmul.f32.vlgmr.msra.gmra.mxu1 %v1735_v44  ;;  %667 = vmatpush.msrb.mxu2 %v302_v14  ;;  %v142_v49 = vld [vmem:[#allocation5 + $0xb8] sm:$0xff]  ;;  %v761_v14 = vld [vmem:[#allocation8 + $0x1a0] sm:$0xff] }
  0xa5   :  { %645 = vmatpush.msrb.mxu1 %v246_v15  ;;  %686 = vmatpush.msrb.mxu3 %v370_v16  ;;  %v270_v50 = vld [vmem:[#allocation5 + $0x4b8] sm:$0xff]  ;;  %v833_v15 = vld [vmem:[#allocation8 + $0x3e0] sm:$0xff] }
  0xa6   :  { %628 = vmatpush.msrb.mxu0 %v170_v17  ;;  %668 = vmatpush.msrb.mxu2 %v298_v18  ;;  %v214_v51 = vld [vmem:[#allocation5 + $0x2f8] sm:$0xff]  ;;  %v757_v16 = vld [vmem:[#allocation8 + $0x180] sm:$0xff] }
  0xa7   :  { %646 = vmatpush.msrb.mxu1 %v242_v19  ;;  %687 = vmatpush.msrb.mxu3 %v366_v20  ;;  %v338_v52 = vld [vmem:[#allocation5 + $0x6d8] sm:$0xff]  ;;  %v829_v17 = vld [vmem:[#allocation8 + $0x3c0] sm:$0xff] }
  0xa8   :  { %629 = vmatpush.msrb.mxu0 %v166_v21  ;;  %669 = vmatpush.msrb.mxu2 %v294_v22  ;;  %v138_v53 = vld [vmem:[#allocation5 + $0x98] sm:$0xff]  ;;  %v825_v18 = vld [vmem:[#allocation8 + $0x3a0] sm:$0xff] }
  0xa9   :  { %647 = vmatpush.msrb.mxu1 %v238_v23  ;;  %688 = vmatpush.msrb.mxu3 %v362_v24  ;;  %v266_v54 = vld [vmem:[#allocation5 + $0x498] sm:$0xff]  ;;  %v749_v19 = vld [vmem:[#allocation8 + $0x140] sm:$0xff] }
  0xaa   :  { %630 = vmatpush.msrb.mxu0 %v162_v25  ;;  %670 = vmatpush.msrb.mxu2 %v290_v26  ;;  %v210_v55 = vld [vmem:[#allocation5 + $0x2d8] sm:$0xff]  ;;  %v821_v20 = vld [vmem:[#allocation8 + $0x380] sm:$0xff] }
  0xab   :  { %648 = vmatpush.msrb.mxu1 %v234_v27  ;;  %689 = vmatpush.msrb.mxu3 %v358_v28  ;;  %v334_v56 = vld [vmem:[#allocation5 + $0x6b8] sm:$0xff]  ;;  %v741_v21 = vld [vmem:[#allocation8 + $0x100] sm:$0xff] }
  0xac   :  { %631 = vmatpush.msrb.mxu0 %v158_v29  ;;  %671 = vmatpush.msrb.mxu2 %v286_v30  ;;  %v134_v57 = vld [vmem:[#allocation5 + $0x78] sm:$0xff]  ;;  %v813_v22 = vld [vmem:[#allocation8 + $0x340] sm:$0xff] }
  0xad   :  { %649 = vmatpush.msrb.mxu1 %v230_v31  ;;  %690 = vmatpush.msrb.mxu3 %v354_v32  ;;  %v262_v58 = vld [vmem:[#allocation5 + $0x478] sm:$0xff]  ;;  %v897_v23 = vld [vmem:[#allocation8 + $0x5e0] sm:$0xff] }
  0xae   :  { %632 = vmatpush.msrb.mxu0 %v154_v34  ;;  %672 = vmatpush.msrb.mxu2 %v282_v35  ;;  %v206_v59 = vld [vmem:[#allocation5 + $0x2b8] sm:$0xff]  ;;  %v809_v24 = vld [vmem:[#allocation8 + $0x320] sm:$0xff] }
  0xaf   :  { %650 = vmatpush.msrb.mxu1 %v226_v36  ;;  %691 = vmatpush.msrb.mxu3 %v350_v37  ;;  %v330_v60 = vld [vmem:[#allocation5 + $0x698] sm:$0xff]  ;;  %v893_v25 = vld [vmem:[#allocation8 + $0x5c0] sm:$0xff] }
  0xb0   :  { %633 = vmatpush.msrb.mxu0 %v150_v40  ;;  %673 = vmatpush.msrb.mxu2 %v278_v41  ;;  %v130_v61 = vld [vmem:[#allocation5 + $0x58] sm:$0xff]  ;;  %v733_v26 = vld [vmem:[#allocation8 + $0xc0] sm:$0xff] }
  0xb1   :  { %651 = vmatpush.msrb.mxu1 %v222_v42  ;;  %692 = vmatpush.msrb.mxu3 %v346_v43  ;;  %v258_v62 = vld [vmem:[#allocation5 + $0x458] sm:$0xff]  ;;  %v805_v27 = vld [vmem:[#allocation8 + $0x300] sm:$0xff] }
  0xb2   :  { %634 = vmatpush.msrb.mxu0 %v146_v45  ;;  %674 = vmatpush.msrb.mxu2 %v274_v46  ;;  %v202_v63 = vld [vmem:[#allocation5 + $0x298] sm:$0xff]  ;;  %v889_v28 = vld [vmem:[#allocation8 + $0x5a0] sm:$0xff] }
  0xb3   :  { %652 = vmatpush.msrb.mxu1 %v218_v47  ;;  %693 = vmatpush.msrb.mxu3 %v342_v48  ;;  %v326_v0 = vld [vmem:[#allocation5 + $0x678] sm:$0xff]  ;;  %v729_v29 = vld [vmem:[#allocation8 + $0xa0] sm:$0xff] }
  0xb4   :  { %635 = vmatpush.msrb.mxu0 %v142_v49  ;;  %675 = vmatpush.msrb.mxu2 %v270_v50  ;;  %v126_v1 = vld [vmem:[#allocation5 + $0x38] sm:$0xff]  ;;  %v801_v30 = vld [vmem:[#allocation8 + $0x2e0] sm:$0xff] }
  0xb5   :  { %653 = vmatpush.msrb.mxu1 %v214_v51  ;;  %694 = vmatpush.msrb.mxu3 %v338_v52  ;;  %v254_v2 = vld [vmem:[#allocation5 + $0x438] sm:$0xff]  ;;  %v885_v31 = vld [vmem:[#allocation8 + $0x580] sm:$0xff]  ;;  %v770_v51 = vld [vmem:[#allocation8 + $0x1e8] sm:$0xff] }
  0xb6   :  { %636 = vmatpush.msrb.mxu0 %v138_v53  ;;  %676 = vmatpush.msrb.mxu2 %v266_v54  ;;  %v198_v3 = vld [vmem:[#allocation5 + $0x278] sm:$0xff]  ;;  %v725_v32 = vld [vmem:[#allocation8 + $0x80] sm:$0xff]  ;;  %v766_v53 = vld [vmem:[#allocation8 + $0x1c8] sm:$0xff] }
  0xb7   :  { %654 = vmatpush.msrb.mxu1 %v210_v55  ;;  %695 = vmatpush.msrb.mxu3 %v334_v56  ;;  %v322_v4 = vld [vmem:[#allocation5 + $0x658] sm:$0xff]  ;;  %v797_v34 = vld [vmem:[#allocation8 + $0x2c0] sm:$0xff]  ;;  %v762_v56 = vld [vmem:[#allocation8 + $0x1a8] sm:$0xff] }
  0xb8   :  { %637 = vmatpush.msrb.mxu0 %v134_v57  ;;  %677 = vmatpush.msrb.mxu2 %v262_v58  ;;  %v122_v5 = vld [vmem:[#allocation5 + $0x18] sm:$0xff]  ;;  %v881_v35 = vld [vmem:[#allocation8 + $0x560] sm:$0xff]  ;;  %v834_v57 = vld [vmem:[#allocation8 + $0x3e8] sm:$0xff] }
  0xb9   :  { %655 = vmatpush.msrb.mxu1 %v206_v59  ;;  %696 = vmatpush.msrb.mxu3 %v330_v60  ;;  %v250_v6 = vld [vmem:[#allocation5 + $0x418] sm:$0xff]  ;;  %v721_v36 = vld [vmem:[#allocation8 + $0x60] sm:$0xff]  ;;  %v758_v59 = vld [vmem:[#allocation8 + $0x188] sm:$0xff] }
  0xba   :  { %638 = vmatpush.msrb.mxu0 %v130_v61  ;;  %678 = vmatpush.msrb.mxu2 %v258_v62  ;;  %v194_v7 = vld [vmem:[#allocation5 + $0x258] sm:$0xff]  ;;  %v793_v37 = vld [vmem:[#allocation8 + $0x2a0] sm:$0xff]  ;;  %v830_v60 = vld [vmem:[#allocation8 + $0x3c8] sm:$0xff] }
  0xbb   :  { %656 = vmatpush.msrb.mxu1 %v202_v63  ;;  %697 = vmatpush.msrb.mxu3 %v326_v0  ;;  %v318_v8 = vld [vmem:[#allocation5 + $0x638] sm:$0xff]  ;;  %v877_v40 = vld [vmem:[#allocation8 + $0x540] sm:$0xff]  ;;  %v754_v62 = vld [vmem:[#allocation8 + $0x168] sm:$0xff] }
  0xbc   :  { %639 = vmatpush.msrb.mxu0 %v126_v1  ;;  %679 = vmatpush.msrb.mxu2 %v254_v2  ;;  %v190_v10 = vld [vmem:[#allocation5 + $0x238] sm:$0xff]  ;;  %v717_v41 = vld [vmem:[#allocation8 + $0x40] sm:$0xff]  ;;  %v826_v63 = vld [vmem:[#allocation8 + $0x3a8] sm:$0xff] }
  0xbd   :  { %657 = vmatpush.msrb.mxu1 %v198_v3  ;;  %698 = vmatpush.msrb.mxu3 %v322_v4  ;;  %v314_v11 = vld [vmem:[#allocation5 + $0x618] sm:$0xff]  ;;  %v789_v42 = vld [vmem:[#allocation8 + $0x280] sm:$0xff]  ;;  %v1751_v0 = vld [vmem:[#allocation7] sm:$0xf] }
  0xbe   :  { %640 = vmatpush.msrb.mxu0 %v122_v5  ;;  %680 = vmatpush.msrb.mxu2 %v250_v6  ;;  %v186_v13 = vld [vmem:[#allocation5 + $0x218] sm:$0xff]  ;;  %v873_v43 = vld [vmem:[#allocation8 + $0x520] sm:$0xff]  ;;  %v750_v2 = vld [vmem:[#allocation8 + $0x148] sm:$0xff]  ;;  %v377_v5 = vperm.slane %v1751_v0, 0 }
  0xbf   :  { %658 = vmatpush.msrb.mxu1 %v194_v7  ;;  %699 = vmatpush.msrb.mxu3 %v318_v8  ;;  %v713_v45 = vld [vmem:[#allocation8 + $0x20] sm:$0xff]  ;;  %v822_v3 = vld [vmem:[#allocation8 + $0x388] sm:$0xff] }
  0xc0   :  { %681 = vmatmul.f32.vlgmr.msrb.gmra.mxu2 %v1727_v33  ;;  %975 = vmatpush.msra.mxu0 %v769_v9  ;;  %v753_v33 = vld [vmem:[#allocation8 + $0x160] sm:$0xff]  ;;  %v746_v6 = vld [vmem:[#allocation8 + $0x128] sm:$0xff] }
  0xc1   :  { %659 = vmatpush.msrb.mxu1 %v190_v10  ;;  %700 = vmatpush.msrb.mxu3 %v314_v11  ;;  %v785_v46 = vld [vmem:[#allocation8 + $0x260] sm:$0xff]  ;;  %v818_v7 = vld [vmem:[#allocation8 + $0x368] sm:$0xff] }
  0xc2   :  { %641 = vmatmul.f32.vlgmr.msrb.gmra.mxu0 %v1729_v38  ;;  %701 = vmatmul.f32.vlgmr.msrb.gmra.mxu3 %v1732_v39  ;;  %v745_v38 = vld [vmem:[#allocation8 + $0x120] sm:$0xff]  ;;  %v742_v9 = vld [vmem:[#allocation8 + $0x108] sm:$0xff] }
  0xc3   :  { %976 = vmatpush.msra.mxu0 %v765_v12  ;;  %660 = vmatpush.msrb.mxu1 %v186_v13  ;;  %v817_v39 = vld [vmem:[#allocation8 + $0x360] sm:$0xff]  ;;  %v814_v11 = vld [vmem:[#allocation8 + $0x348] sm:$0xff] }
  0xc4   :  { %661 = vmatmul.f32.vlgmr.msrb.gmra.mxu1 %v1735_v44  ;;  %v737_v44 = vld [vmem:[#allocation8 + $0xe0] sm:$0xff]  ;;  %1015 = vmatpush.msra.mxu2 %v897_v23  ;;  %v890_v23 = vld [vmem:[#allocation8 + $0x5a8] sm:$0xff] }
  0xc5   :  { %977 = vmatpush.msra.mxu0 %v761_v14  ;;  %995 = vmatpush.msra.mxu1 %v833_v15  ;;  %v869_v47 = vld [vmem:[#allocation8 + $0x500] sm:$0xff]  ;;  %v898_v15 = vld [vmem:[#allocation8 + $0x5e8] sm:$0xff] }
  0xc6   :  { %1016 = vmatpush.msra.mxu2 %v893_v25  ;;  %v709_v48 = vld [vmem:[#allocation8] sm:$0xff]  ;;  %v802_v25 = vld [vmem:[#allocation8 + $0x2e8] sm:$0xff] }
  0xc7   :  { %978 = vmatpush.msra.mxu0 %v757_v16  ;;  %996 = vmatpush.msra.mxu1 %v829_v17  ;;  %v781_v49 = vld [vmem:[#allocation8 + $0x240] sm:$0xff]  ;;  %v738_v16 = vld [vmem:[#allocation8 + $0xe8] sm:$0xff] }
  0xc8   :  { %1017 = vmatpush.msra.mxu2 %v889_v28  ;;  %v865_v50 = vld [vmem:[#allocation8 + $0x4e0] sm:$0xff]  ;;  %v810_v17 = vld [vmem:[#allocation8 + $0x328] sm:$0xff] }
  0xc9   :  { %979 = vmatpush.msra.mxu0 %v753_v33  ;;  %997 = vmatpush.msra.mxu1 %v825_v18  ;;  %v777_v52 = vld [vmem:[#allocation8 + $0x220] sm:$0xff]  ;;  %v886_v28 = vld [vmem:[#allocation8 + $0x588] sm:$0xff] }
  0xca   :  { %1018 = vmatpush.msra.mxu2 %v885_v31  ;;  %v861_v54 = vld [vmem:[#allocation8 + $0x4c0] sm:$0xff]  ;;  %v798_v31 = vld [vmem:[#allocation8 + $0x2c8] sm:$0xff] }
  0xcb   :  { %980 = vmatpush.msra.mxu0 %v749_v19  ;;  %998 = vmatpush.msra.mxu1 %v821_v20  ;;  %v773_v55 = vld [vmem:[#allocation8 + $0x200] sm:$0xff]  ;;  %v894_v19 = vld [vmem:[#allocation8 + $0x5c8] sm:$0xff] }
  0xcc   :  { %1019 = vmatpush.msra.mxu2 %v881_v35  ;;  %v857_v58 = vld [vmem:[#allocation8 + $0x4a0] sm:$0xff]  ;;  %v734_v20 = vld [vmem:[#allocation8 + $0xc8] sm:$0xff] }
  0xcd   :  { %981 = vmatpush.msra.mxu0 %v745_v38  ;;  %999 = vmatpush.msra.mxu1 %v817_v39  ;;  %v853_v61 = vld [vmem:[#allocation8 + $0x480] sm:$0xff]  ;;  %v722_v35 = vld [vmem:[#allocation8 + $0x68] sm:$0xff] }
  0xce   :  { %1020 = vmatpush.msra.mxu2 %v877_v40  ;;  %v849_v1 = vld [vmem:[#allocation8 + $0x460] sm:$0xff] }
  0xcf   :  { %982 = vmatpush.msra.mxu0 %v741_v21  ;;  %1000 = vmatpush.msra.mxu1 %v813_v22  ;;  %v845_v4 = vld [vmem:[#allocation8 + $0x440] sm:$0xff]  ;;  %v806_v21 = vld [vmem:[#allocation8 + $0x308] sm:$0xff] }
  0xd0   :  { %1021 = vmatpush.msra.mxu2 %v873_v43  ;;  %v841_v8 = vld [vmem:[#allocation8 + $0x420] sm:$0xff]  ;;  %v790_v43 = vld [vmem:[#allocation8 + $0x288] sm:$0xff] }
  0xd1   :  { %983 = vmatpush.msra.mxu0 %v737_v44  ;;  %1001 = vmatpush.msra.mxu1 %v809_v24  ;;  %v837_v12 = vld [vmem:[#allocation8 + $0x400] sm:$0xff]  ;;  %v730_v44 = vld [vmem:[#allocation8 + $0xa8] sm:$0xff] }
  0xd2   :  { %1022 = vmatpush.msra.mxu2 %v869_v47  ;;  %v961_v13 = vld [vmem:[#allocation8 + $0x7e0] sm:$0xff]  ;;  %v874_v47 = vld [vmem:[#allocation8 + $0x528] sm:$0xff] }
  0xd3   :  { %984 = vmatpush.msra.mxu0 %v733_v26  ;;  %1002 = vmatpush.msra.mxu1 %v805_v27  ;;  %v957_v33 = vld [vmem:[#allocation8 + $0x7c0] sm:$0xff] }
  0xd4   :  { %1023 = vmatpush.msra.mxu2 %v865_v50  ;;  %1035 = vmatpush.msra.mxu3 %v961_v13  ;;  %v953_v22 = vld [vmem:[#allocation8 + $0x7a0] sm:$0xff]  ;;  %v854_v13 = vld [vmem:[#allocation8 + $0x488] sm:$0xff] }
  0xd5   :  { %985 = vmatpush.msra.mxu0 %v729_v29  ;;  %1003 = vmatpush.msra.mxu1 %v801_v30  ;;  %v949_v26 = vld [vmem:[#allocation8 + $0x780] sm:$0xff]  ;;  %v726_v29 = vld [vmem:[#allocation8 + $0x88] sm:$0xff] }
  0xd6   :  { %1024 = vmatpush.msra.mxu2 %v861_v54  ;;  %1036 = vmatpush.msra.mxu3 %v957_v33  ;;  %v941_v40 = vld [vmem:[#allocation8 + $0x740] sm:$0xff]  ;;  %v782_v54 = vld [vmem:[#allocation8 + $0x248] sm:$0xff] }
  0xd7   :  { %986 = vmatpush.msra.mxu0 %v725_v32  ;;  %1004 = vmatpush.msra.mxu1 %v797_v34  ;;  %v945_v32 = vld [vmem:[#allocation8 + $0x760] sm:$0xff]  ;;  %v882_v34 = vld [vmem:[#allocation8 + $0x568] sm:$0xff] }
  0xd8   :  { %1025 = vmatpush.msra.mxu2 %v857_v58  ;;  %1037 = vmatpush.msra.mxu3 %v953_v22  ;;  %v933_v50 = vld [vmem:[#allocation8 + $0x700] sm:$0xff]  ;;  %v778_v58 = vld [vmem:[#allocation8 + $0x228] sm:$0xff]  ;;  %v827_v22 = vld [vmem:[#allocation8 + $0x3b0] sm:$0xff] }
  0xd9   :  { %987 = vmatpush.msra.mxu0 %v721_v36  ;;  %1005 = vmatpush.msra.mxu1 %v793_v37  ;;  %v794_v37 = vld [vmem:[#allocation8 + $0x2a8] sm:$0xff] }
  0xda   :  { %1026 = vmatpush.msra.mxu2 %v853_v61  ;;  %1038 = vmatpush.msra.mxu3 %v949_v26  ;;  %v850_v33 = vld [vmem:[#allocation8 + $0x468] sm:$0xff] }
  0xdb   :  { %988 = vmatpush.msra.mxu0 %v717_v41  ;;  %1006 = vmatpush.msra.mxu1 %v789_v42  ;;  %v878_v41 = vld [vmem:[#allocation8 + $0x548] sm:$0xff] }
  0xdc   :  { %1027 = vmatpush.msra.mxu2 %v849_v1  ;;  %1039 = vmatpush.msra.mxu3 %v945_v32  ;;  %v718_v42 = vld [vmem:[#allocation8 + $0x48] sm:$0xff]  ;;  %v925_v1 = vld [vmem:[#allocation8 + $0x6c0] sm:$0xff] }
  0xdd   :  { %989 = vmatpush.msra.mxu0 %v713_v45  ;;  %1007 = vmatpush.msra.mxu1 %v785_v46  ;;  %v378_v45 = vperm.slane %v1751_v0, 1  ;;  %v937_v46 = vld [vmem:[#allocation8 + $0x720] sm:$0xff]  ;;  %v838_v26 = vld [vmem:[#allocation8 + $0x408] sm:$0xff] }
  0xde   :  { %1028 = vmatpush.msra.mxu2 %v845_v4  ;;  %1040 = vmatpush.msra.mxu3 %v941_v40  ;;  %v862_v4 = vld [vmem:[#allocation8 + $0x4c8] sm:$0xff]  ;;  %v723_v40 = vld [vmem:[#allocation8 + $0x70] sm:$0xff] }
  0xdf   :  { %990 = vmatpush.msra.mxu0 %v709_v48  ;;  %1008 = vmatpush.msra.mxu1 %v781_v49  ;;  %v714_v48 = vld [vmem:[#allocation8 + $0x28] sm:$0xff] }
  0xe0   :  { %1029 = vmatpush.msra.mxu2 %v841_v8  ;;  %v786_v49 = vld [vmem:[#allocation8 + $0x268] sm:$0xff]  ;;  %1041 = vmatpush.msra.mxu3 %v937_v46 }
  0xe1   :  { %1055 = vmatpush.msrb.mxu0 %v770_v51  ;;  %1009 = vmatpush.msra.mxu1 %v777_v52  ;;  %v870_v51 = vld [vmem:[#allocation8 + $0x508] sm:$0xff] }
  0xe2   :  { %1030 = vmatpush.msra.mxu2 %v837_v12  ;;  %v710_v52 = vld [vmem:[#allocation8 + $0x8] sm:$0xff]  ;;  %1042 = vmatpush.msra.mxu3 %v933_v50  ;;  %v711_v50 = vld [vmem:[#allocation8 + $0x10] sm:$0xff] }
  0xe3   :  { %1056 = vmatpush.msrb.mxu0 %v766_v53  ;;  %1010 = vmatpush.msra.mxu1 %v773_v55  ;;  %v771_v55 = vld [vmem:[#allocation8 + $0x1f0] sm:$0xff]  ;;  %v958_v32 = vld [vmem:[#allocation8 + $0x7c8] sm:$0xff] }
  0xe4   :  { %1095 = vmatpush.msrb.mxu2 %v898_v15  ;;  %v946_v46 = vld [vmem:[#allocation8 + $0x768] sm:$0xff] }
  0xe5   :  { %1057 = vmatpush.msrb.mxu0 %v762_v56  ;;  %1075 = vmatpush.msrb.mxu1 %v834_v57  ;;  %v929_v57 = vld [vmem:[#allocation8 + $0x6e0] sm:$0xff] }
  0xe6   :  { %1096 = vmatpush.msrb.mxu2 %v894_v19  ;;  %1043 = vmatpush.msra.mxu3 %v929_v57  ;;  %v747_v19 = vld [vmem:[#allocation8 + $0x130] sm:$0xff]  ;;  %v934_v57 = vld [vmem:[#allocation8 + $0x708] sm:$0xff] }
  0xe7   :  { %1058 = vmatpush.msrb.mxu0 %v758_v59  ;;  %1076 = vmatpush.msrb.mxu1 %v830_v60  ;;  %v767_v59 = vld [vmem:[#allocation8 + $0x1d0] sm:$0xff]  ;;  %v866_v60 = vld [vmem:[#allocation8 + $0x4e8] sm:$0xff] }
  0xe8   :  { %1097 = vmatpush.msrb.mxu2 %v890_v23  ;;  %1044 = vmatpush.msra.mxu3 %v925_v1  ;;  %v842_v23 = vld [vmem:[#allocation8 + $0x428] sm:$0xff] }
  0xe9   :  { %1059 = vmatpush.msrb.mxu0 %v754_v62  ;;  %1077 = vmatpush.msrb.mxu1 %v826_v63  ;;  %v774_v63 = vld [vmem:[#allocation8 + $0x208] sm:$0xff] }
  0xea   :  { %1098 = vmatpush.msrb.mxu2 %v886_v28  ;;  %v819_v28 = vld [vmem:[#allocation8 + $0x370] sm:$0xff] }
  0xeb   :  { %1060 = vmatpush.msrb.mxu0 %v750_v2  ;;  %1078 = vmatpush.msrb.mxu1 %v822_v3  ;;  %v402_v10 = vpop.f32.mrf.mxu0  ;;  %v763_v2 = vld [vmem:[#allocation8 + $0x1b0] sm:$0xff] }
  0xec   :  { %v403_v14 = vadd.f32 %v402_v10, %v377_v5  ;;  %1099 = vmatpush.msrb.mxu2 %v882_v34  ;;  %v921_v5 = vld [vmem:[#allocation8 + $0x6a0] sm:$0xff]  ;;  %v727_v34 = vld [vmem:[#allocation8 + $0x90] sm:$0xff] }
  0xed   :  { %1061 = vmatpush.msrb.mxu0 %v746_v6  ;;  %1079 = vmatpush.msrb.mxu1 %v818_v7  ;;  %v759_v6 = vld [vmem:[#allocation8 + $0x190] sm:$0xff]  ;;  %v917_v10 = vld [vmem:[#allocation8 + $0x680] sm:$0xff] }
  0xee   :  { %v422_v18 = vpop.f32.mrf.mxu1  ;;  %1100 = vmatpush.msrb.mxu2 %v878_v41  ;;  %1045 = vmatpush.msra.mxu3 %v921_v5  ;;  %v807_v41 = vld [vmem:[#allocation8 + $0x310] sm:$0xff]  ;;  %v760_v5 = vld [vmem:[#allocation8 + $0x198] sm:$0xff] }
  0xef   :  { %1062 = vmatpush.msrb.mxu0 %v742_v9  ;;  %1080 = vmatpush.msrb.mxu1 %v814_v11  ;;  %v423_v38 = vadd.f32 %v422_v18, %v403_v14  ;;  %v442_v39 = vpop.f32.mrf.mxu2  ;;  %v858_v9 = vld [vmem:[#allocation8 + $0x4a8] sm:$0xff]  ;;  %v755_v11 = vld [vmem:[#allocation8 + $0x170] sm:$0xff]  ;;  %v913_v14 = vld [vmem:[#allocation8 + $0x660] sm:$0xff] }
  0xf0   :  { %1101 = vmatpush.msrb.mxu2 %v874_v47  ;;  %1046 = vmatpush.msra.mxu3 %v917_v10  ;;  %v909_v18 = vld [vmem:[#allocation8 + $0x640] sm:$0xff]  ;;  %v715_v47 = vld [vmem:[#allocation8 + $0x30] sm:$0xff] }
  0xf1   :  { %1063 = vmatpush.msrb.mxu0 %v738_v16  ;;  %1081 = vmatpush.msrb.mxu1 %v810_v17  ;;  %v443_v24 = vadd.f32 %v442_v39, %v423_v38  ;;  %v751_v16 = vld [vmem:[#allocation8 + $0x150] sm:$0xff]  ;;  %v846_v38 = vld [vmem:[#allocation8 + $0x448] sm:$0xff]  ;;  %v905_v39 = vld [vmem:[#allocation8 + $0x620] sm:$0xff] }
  0xf2   :  { %v462_v27 = vpop.f32.mrf.mxu3  ;;  %1102 = vmatpush.msrb.mxu2 %v870_v51  ;;  %v835_v17 = vld [vmem:[#allocation8 + $0x3f0] sm:$0xff]  ;;  %1047 = vmatpush.msra.mxu3 %v913_v14  ;;  %v379_v51 = vperm.slane %v1751_v0, 2  ;;  %v752_v14 = vld [vmem:[#allocation8 + $0x158] sm:$0xff] }
  0xf3   :  { %1064 = vmatpush.msrb.mxu0 %v734_v20  ;;  %1082 = vmatpush.msrb.mxu1 %v806_v21  ;;  %v463_v30 = vadd.f32 %v462_v27, %v443_v24  ;;  %v831_v20 = vld [vmem:[#allocation8 + $0x3d0] sm:$0xff] }
  0xf4   :  { %1103 = vmatpush.msrb.mxu2 %v866_v60  ;;  %v743_v21 = vld [vmem:[#allocation8 + $0x110] sm:$0xff]  ;;  %1048 = vmatpush.msra.mxu3 %v909_v18  ;;  %v748_v18 = vld [vmem:[#allocation8 + $0x138] sm:$0xff] }
  0xf5   :  { %1065 = vmatpush.msrb.mxu0 %v730_v44  ;;  %1083 = vmatpush.msrb.mxu1 %v802_v25  ;;  %v1754_v36 = vmax.f32 %v463_v30, 0.0  ;;  %v901_v44 = vld [vmem:[#allocation8 + $0x600] sm:$0xff]  ;;  %v739_v24 = vld [vmem:[#allocation8 + $0xf0] sm:$0xff] }
  0xf6   :  { %1104 = vmatpush.msrb.mxu2 %v862_v4  ;;  %v823_v25 = vld [vmem:[#allocation8 + $0x390] sm:$0xff]  ;;  %1049 = vmatpush.msra.mxu3 %v905_v39  ;;  %v744_v39 = vld [vmem:[#allocation8 + $0x118] sm:$0xff] }
  0xf7   :  { %1066 = vmatpush.msrb.mxu0 %v726_v29  ;;  %1084 = vmatpush.msrb.mxu1 %v798_v31  ;;  %v735_v27 = vld [vmem:[#allocation8 + $0xd0] sm:$0xff]  ;;  %v962_v29 = vld [vmem:[#allocation8 + $0x7e8] sm:$0xff] }
  0xf8   :  { %991 = vmatmul.f32.vlgmr.msra.gmra.mxu0 %v1754_v36  ;;  %1105 = vmatpush.msrb.mxu2 %v858_v9  ;;  %v731_v30 = vld [vmem:[#allocation8 + $0xb0] sm:$0xff]  ;;  %v756_v9 = vld [vmem:[#allocation8 + $0x178] sm:$0xff] }
  0xf9   :  { %1067 = vmatpush.msrb.mxu0 %v722_v35  ;;  %1085 = vmatpush.msrb.mxu1 %v794_v37  ;;  %v815_v31 = vld [vmem:[#allocation8 + $0x350] sm:$0xff]  ;;  %v954_v37 = vld [vmem:[#allocation8 + $0x7a8] sm:$0xff] }
  0xfa   :  { %1106 = vmatpush.msrb.mxu2 %v854_v13  ;;  %1050 = vmatpush.msra.mxu3 %v901_v44  ;;  %v811_v35 = vld [vmem:[#allocation8 + $0x330] sm:$0xff]  ;;  %v740_v44 = vld [vmem:[#allocation8 + $0xf8] sm:$0xff] }
  0xfb   :  { %1068 = vmatpush.msrb.mxu0 %v718_v42  ;;  %1086 = vmatpush.msrb.mxu1 %v790_v43  ;;  %v482_v53 = vpop.f32.mrf.mxu0  ;;  %v950_v42 = vld [vmem:[#allocation8 + $0x788] sm:$0xff]  ;;  %v719_v43 = vld [vmem:[#allocation8 + $0x50] sm:$0xff] }
  0xfc   :  { %v483_v56 = vadd.f32 %v482_v53, %v378_v45  ;;  %1107 = vmatpush.msrb.mxu2 %v850_v33  ;;  %1115 = vmatpush.msrb.mxu3 %v962_v29  ;;  %v803_v45 = vld [vmem:[#allocation8 + $0x2f0] sm:$0xff]  ;;  %v938_v53 = vld [vmem:[#allocation8 + $0x728] sm:$0xff]  ;;  %v820_v29 = vld [vmem:[#allocation8 + $0x378] sm:$0xff] }
  0xfd   :  { %1069 = vmatpush.msrb.mxu0 %v714_v48  ;;  %1087 = vmatpush.msrb.mxu1 %v786_v49  ;;  %v799_v48 = vld [vmem:[#allocation8 + $0x2d0] sm:$0xff]  ;;  %v942_v49 = vld [vmem:[#allocation8 + $0x748] sm:$0xff] }
  0xfe   :  { %1108 = vmatpush.msrb.mxu2 %v846_v38  ;;  %1116 = vmatpush.msrb.mxu3 %v958_v32  ;;  %v787_v60 = vld [vmem:[#allocation8 + $0x270] sm:$0xff]  ;;  %v910_v38 = vld [vmem:[#allocation8 + $0x648] sm:$0xff]  ;;  %v816_v32 = vld [vmem:[#allocation8 + $0x358] sm:$0xff] }
  0xff   :  { %1070 = vmatpush.msrb.mxu0 %v710_v52  ;;  %1088 = vmatpush.msrb.mxu1 %v782_v54  ;;  %v502_v61 = vpop.f32.mrf.mxu1  ;;  %v522_v62 = vpop.f32.mrf.mxu2  ;;  %v795_v52 = vld [vmem:[#allocation8 + $0x2b0] sm:$0xff]  ;;  %v772_v54 = vld [vmem:[#allocation8 + $0x1f8] sm:$0xff] }
 0x100   :  { %v503_v3 = vadd.f32 %v502_v61, %v483_v56  ;;  %1071 = vmatmul.f32.vlgmr.msrb.gmra.mxu0 %v1754_v36  ;;  %1109 = vmatpush.msrb.mxu2 %v842_v23  ;;  %v930_v61 = vld [vmem:[#allocation8 + $0x6e8] sm:$0xff] }
 0x101   :  { %1135 = vmatpush.msra.mxu0 %v771_v55  ;;  %1089 = vmatpush.msrb.mxu1 %v778_v58  ;;  %v791_v55 = vld [vmem:[#allocation8 + $0x290] sm:$0xff]  ;;  %v768_v58 = vld [vmem:[#allocation8 + $0x1d8] sm:$0xff]  ;;  %v906_v23 = vld [vmem:[#allocation8 + $0x628] sm:$0xff] }
 0x102   :  { %v523_v7 = vadd.f32 %v522_v62, %v503_v3  ;;  %v542_v8 = vpop.f32.mrf.mxu3  ;;  %1110 = vmatpush.msrb.mxu2 %v838_v26  ;;  %1117 = vmatpush.msrb.mxu3 %v954_v37  ;;  %v764_v62 = vld [vmem:[#allocation8 + $0x1b8] sm:$0xff]  ;;  %v926_v3 = vld [vmem:[#allocation8 + $0x6c8] sm:$0xff] }
 0x103   :  { %1136 = vmatpush.msra.mxu0 %v767_v59  ;;  %1090 = vmatpush.msrb.mxu1 %v774_v63  ;;  %v783_v63 = vld [vmem:[#allocation8 + $0x250] sm:$0xff]  ;;  %v902_v26 = vld [vmem:[#allocation8 + $0x608] sm:$0xff]  ;;  %v812_v37 = vld [vmem:[#allocation8 + $0x338] sm:$0xff] }
 0x104   :  { %v543_v12 = vadd.f32 %v542_v8, %v523_v7  ;;  %1118 = vmatpush.msrb.mxu3 %v950_v42  ;;  %v922_v7 = vld [vmem:[#allocation8 + $0x6a8] sm:$0xff]  ;;  %v808_v42 = vld [vmem:[#allocation8 + $0x318] sm:$0xff] }
 0x105   :  { %1137 = vmatpush.msra.mxu0 %v763_v2 }
 0x106   :  { %v1759_v15 = vmax.f32 %v543_v12, 0.0  ;;  %1119 = vmatpush.msrb.mxu3 %v946_v46  ;;  %v918_v12 = vld [vmem:[#allocation8 + $0x688] sm:$0xff]  ;;  %v804_v46 = vld [vmem:[#allocation8 + $0x2f8] sm:$0xff] }
 0x107   :  { %1138 = vmatpush.msra.mxu0 %v759_v6  ;;  %v779_v6 = vld [vmem:[#allocation8 + $0x230] sm:$0xff] }
 0x108   :  { %1011 = vmatmul.f32.vlgmr.msra.gmra.mxu1 %v1759_v15  ;;  %1120 = vmatpush.msrb.mxu3 %v942_v49  ;;  %v800_v49 = vld [vmem:[#allocation8 + $0x2d8] sm:$0xff] }
 0x109   :  { %1139 = vmatpush.msra.mxu0 %v755_v11  ;;  %1155 = vmatpush.msra.mxu1 %v835_v17  ;;  %v775_v11 = vld [vmem:[#allocation8 + $0x210] sm:$0xff]  ;;  %v914_v17 = vld [vmem:[#allocation8 + $0x668] sm:$0xff] }
 0x10a   :  { %1121 = vmatpush.msrb.mxu3 %v938_v53  ;;  %v380_v53 = vperm.slane %v1751_v0, 3  ;;  %v847_v0 = vld [vmem:[#allocation8 + $0x450] sm:$0xff] }
 0x10b   :  { %1140 = vmatpush.msra.mxu0 %v751_v16  ;;  %1156 = vmatpush.msra.mxu1 %v831_v20  ;;  %v836_v16 = vld [vmem:[#allocation8 + $0x3f8] sm:$0xff] }
 0x10c   :  { %1122 = vmatpush.msrb.mxu3 %v934_v57  ;;  %v832_v20 = vld [vmem:[#allocation8 + $0x3d8] sm:$0xff] }
 0x10d   :  { %1141 = vmatpush.msra.mxu0 %v747_v19  ;;  %1157 = vmatpush.msra.mxu1 %v827_v22  ;;  %v899_v19 = vld [vmem:[#allocation8 + $0x5f0] sm:$0xff]  ;;  %v828_v22 = vld [vmem:[#allocation8 + $0x3b8] sm:$0xff] }
 0x10e   :  { %1123 = vmatpush.msrb.mxu3 %v930_v61 }
 0x10f   :  { %1142 = vmatpush.msra.mxu0 %v743_v21  ;;  %1158 = vmatpush.msra.mxu1 %v823_v25  ;;  %v895_v21 = vld [vmem:[#allocation8 + $0x5d0] sm:$0xff]  ;;  %v824_v25 = vld [vmem:[#allocation8 + $0x398] sm:$0xff] }
 0x110   :  { %1091 = vmatmul.f32.vlgmr.msrb.gmra.mxu1 %v1759_v15  ;;  %1124 = vmatpush.msrb.mxu3 %v926_v3 }
 0x111   :  { %1143 = vmatpush.msra.mxu0 %v739_v24  ;;  %1159 = vmatpush.msra.mxu1 %v819_v28  ;;  %v891_v24 = vld [vmem:[#allocation8 + $0x5b0] sm:$0xff] }
 0x112   :  { %1125 = vmatpush.msrb.mxu3 %v922_v7  ;;  %v887_v28 = vld [vmem:[#allocation8 + $0x590] sm:$0xff] }
 0x113   :  { %1144 = vmatpush.msra.mxu0 %v735_v27  ;;  %1160 = vmatpush.msra.mxu1 %v815_v31  ;;  %v736_v27 = vld [vmem:[#allocation8 + $0xd8] sm:$0xff]  ;;  %v883_v31 = vld [vmem:[#allocation8 + $0x570] sm:$0xff] }
 0x114   :  { %1126 = vmatpush.msrb.mxu3 %v918_v12  ;;  %v839_v7 = vld [vmem:[#allocation8 + $0x410] sm:$0xff]  ;;  %v896_v12 = vld [vmem:[#allocation8 + $0x5d8] sm:$0xff] }
 0x115   :  { %1145 = vmatpush.msra.mxu0 %v731_v30  ;;  %1161 = vmatpush.msra.mxu1 %v811_v35  ;;  %v732_v30 = vld [vmem:[#allocation8 + $0xb8] sm:$0xff]  ;;  %v879_v35 = vld [vmem:[#allocation8 + $0x550] sm:$0xff] }
 0x116   :  { %1127 = vmatpush.msrb.mxu3 %v914_v17  ;;  %v888_v17 = vld [vmem:[#allocation8 + $0x598] sm:$0xff] }
 0x117   :  { %1146 = vmatpush.msra.mxu0 %v727_v34  ;;  %1162 = vmatpush.msra.mxu1 %v807_v41  ;;  %v728_v34 = vld [vmem:[#allocation8 + $0x98] sm:$0xff]  ;;  %v875_v41 = vld [vmem:[#allocation8 + $0x530] sm:$0xff] }
 0x118   :  { %1128 = vmatpush.msrb.mxu3 %v910_v38  ;;  %v939_v38 = vld [vmem:[#allocation8 + $0x730] sm:$0xff] }
 0x119   :  { %1147 = vmatpush.msra.mxu0 %v723_v40  ;;  %1163 = vmatpush.msra.mxu1 %v803_v45  ;;  %v724_v40 = vld [vmem:[#allocation8 + $0x78] sm:$0xff]  ;;  %v871_v45 = vld [vmem:[#allocation8 + $0x510] sm:$0xff] }
 0x11a   :  { %1129 = vmatpush.msrb.mxu3 %v906_v23  ;;  %v931_v23 = vld [vmem:[#allocation8 + $0x6f0] sm:$0xff] }
 0x11b   :  { %1148 = vmatpush.msra.mxu0 %v719_v43  ;;  %1164 = vmatpush.msra.mxu1 %v799_v48  ;;  %v720_v43 = vld [vmem:[#allocation8 + $0x58] sm:$0xff]  ;;  %v867_v48 = vld [vmem:[#allocation8 + $0x4f0] sm:$0xff] }
 0x11c   :  { %1130 = vmatpush.msrb.mxu3 %v902_v26  ;;  %v923_v26 = vld [vmem:[#allocation8 + $0x6b0] sm:$0xff] }
 0x11d   :  { %1149 = vmatpush.msra.mxu0 %v715_v47  ;;  %v562_v56 = vpop.f32.mrf.mxu0  ;;  %1165 = vmatpush.msra.mxu1 %v795_v52  ;;  %v716_v47 = vld [vmem:[#allocation8 + $0x38] sm:$0xff] }
 0x11e   :  { %v563_v59 = vadd.f32 %v562_v56, %v379_v51  ;;  %v863_v51 = vld [vmem:[#allocation8 + $0x4d0] sm:$0xff]  ;;  %v796_v52 = vld [vmem:[#allocation8 + $0x2b8] sm:$0xff] }
 0x11f   :  { %1150 = vmatpush.msra.mxu0 %v711_v50  ;;  %1166 = vmatpush.msra.mxu1 %v791_v55  ;;  %v712_v50 = vld [vmem:[#allocation8 + $0x18] sm:$0xff]  ;;  %v855_v56 = vld [vmem:[#allocation8 + $0x490] sm:$0xff] }
 0x120   :  { %1151 = vmatmul.f32.vlgmr.msra.gmra.mxu0 %v1754_v36  ;;  %v792_v55 = vld [vmem:[#allocation8 + $0x298] sm:$0xff] }
 0x121   :  { %1215 = vmatpush.msrb.mxu0 %v772_v54  ;;  %v582_v1 = vpop.f32.mrf.mxu1  ;;  %v602_v2 = vpop.f32.mrf.mxu2  ;;  %1167 = vmatpush.msra.mxu1 %v787_v60  ;;  %v859_v54 = vld [vmem:[#allocation8 + $0x4b0] sm:$0xff] }
 0x122   :  { %v583_v4 = vadd.f32 %v582_v1, %v563_v59  ;;  %v851_v60 = vld [vmem:[#allocation8 + $0x470] sm:$0xff] }
 0x123   :  { %1216 = vmatpush.msrb.mxu0 %v768_v58  ;;  %1168 = vmatpush.msra.mxu1 %v783_v63  ;;  %v788_v58 = vld [vmem:[#allocation8 + $0x278] sm:$0xff] }
 0x124   :  { %v603_v8 = vadd.f32 %v602_v2, %v583_v4  ;;  %v622_v10 = vpop.f32.mrf.mxu3  ;;  %v780_v2 = vld [vmem:[#allocation8 + $0x238] sm:$0xff] }
 0x125   :  { %1217 = vmatpush.msrb.mxu0 %v764_v62  ;;  %1169 = vmatpush.msra.mxu1 %v779_v6  ;;  %v784_v62 = vld [vmem:[#allocation8 + $0x258] sm:$0xff] }
 0x126   :  { %v623_v13 = vadd.f32 %v622_v10, %v603_v8  ;;  %v900_v10 = vld [vmem:[#allocation8 + $0x5f8] sm:$0xff] }
 0x127   :  { %1218 = vmatpush.msrb.mxu0 %v760_v5  ;;  %1170 = vmatpush.msra.mxu1 %v775_v11  ;;  %v776_v5 = vld [vmem:[#allocation8 + $0x218] sm:$0xff]  ;;  %v959_v11 = vld [vmem:[#allocation8 + $0x7d0] sm:$0xff] }
 0x128   :  { %v1765_v33 = vmax.f32 %v623_v13, 0.0  ;;  %1171 = vmatmul.f32.vlgmr.msra.gmra.mxu1 %v1759_v15  ;;  %v955_v13 = vld [vmem:[#allocation8 + $0x7b0] sm:$0xff] }
 0x129   :  { %1219 = vmatpush.msrb.mxu0 %v756_v9  ;;  %1235 = vmatpush.msrb.mxu1 %v836_v16  ;;  %v963_v9 = vld [vmem:[#allocation8 + $0x7f0] sm:$0xff] }
 0x12a   :  { %1031 = vmatmul.f32.vlgmr.msra.gmra.mxu2 %v1765_v33  ;;  %v951_v16 = vld [vmem:[#allocation8 + $0x790] sm:$0xff] }
 0x12b   :  { %1220 = vmatpush.msrb.mxu0 %v752_v14  ;;  %1175 = vmatpush.msra.mxu2 %v899_v19  ;;  %v892_v14 = vld [vmem:[#allocation8 + $0x5b8] sm:$0xff] }
 0x12c   :  { %1236 = vmatpush.msrb.mxu1 %v832_v20  ;;  %v884_v19 = vld [vmem:[#allocation8 + $0x578] sm:$0xff] }
 0x12d   :  { %1221 = vmatpush.msrb.mxu0 %v748_v18  ;;  %1176 = vmatpush.msra.mxu2 %v895_v21  ;;  %v947_v18 = vld [vmem:[#allocation8 + $0x770] sm:$0xff]  ;;  %v880_v20 = vld [vmem:[#allocation8 + $0x558] sm:$0xff] }
 0x12e   :  { %1237 = vmatpush.msrb.mxu1 %v828_v22  ;;  %v935_v21 = vld [vmem:[#allocation8 + $0x710] sm:$0xff]  ;;  %v872_v22 = vld [vmem:[#allocation8 + $0x518] sm:$0xff] }
 0x12f   :  { %1222 = vmatpush.msrb.mxu0 %v744_v39  ;;  %1177 = vmatpush.msra.mxu2 %v891_v24  ;;  %v876_v39 = vld [vmem:[#allocation8 + $0x538] sm:$0xff]  ;;  %v927_v24 = vld [vmem:[#allocation8 + $0x6d0] sm:$0xff] }
 0x130   :  { %1238 = vmatpush.msrb.mxu1 %v824_v25  ;;  %v864_v25 = vld [vmem:[#allocation8 + $0x4d8] sm:$0xff] }
 0x131   :  { %1223 = vmatpush.msrb.mxu0 %v740_v44  ;;  %1178 = vmatpush.msra.mxu2 %v887_v28  ;;  %v868_v44 = vld [vmem:[#allocation8 + $0x4f8] sm:$0xff]  ;;  %v919_v28 = vld [vmem:[#allocation8 + $0x690] sm:$0xff] }
 0x132   :  { %1111 = vmatmul.f32.vlgmr.msrb.gmra.mxu2 %v1765_v33  ;;  %1239 = vmatpush.msrb.mxu1 %v820_v29  ;;  %v856_v29 = vld [vmem:[#allocation8 + $0x498] sm:$0xff] }
 0x133   :  { %1224 = vmatpush.msrb.mxu0 %v736_v27  ;;  %1179 = vmatpush.msra.mxu2 %v883_v31  ;;  %v860_v27 = vld [vmem:[#allocation8 + $0x4b8] sm:$0xff] }
 0x134   :  { %1240 = vmatpush.msrb.mxu1 %v816_v32  ;;  %v852_v31 = vld [vmem:[#allocation8 + $0x478] sm:$0xff]  ;;  %v911_v32 = vld [vmem:[#allocation8 + $0x650] sm:$0xff] }
 0x135   :  { %1225 = vmatpush.msrb.mxu0 %v732_v30  ;;  %1180 = vmatpush.msra.mxu2 %v879_v35  ;;  %v915_v30 = vld [vmem:[#allocation8 + $0x670] sm:$0xff] }
 0x136   :  { %1241 = vmatpush.msrb.mxu1 %v812_v37  ;;  %v907_v35 = vld [vmem:[#allocation8 + $0x630] sm:$0xff]  ;;  %v844_v37 = vld [vmem:[#allocation8 + $0x438] sm:$0xff] }
 0x137   :  { %1226 = vmatpush.msrb.mxu0 %v728_v34  ;;  %1181 = vmatpush.msra.mxu2 %v875_v41  ;;  %v848_v34 = vld [vmem:[#allocation8 + $0x458] sm:$0xff] }
 0x138   :  { %1242 = vmatpush.msrb.mxu1 %v808_v42  ;;  %v840_v41 = vld [vmem:[#allocation8 + $0x418] sm:$0xff] }
 0x139   :  { %1227 = vmatpush.msrb.mxu0 %v724_v40  ;;  %1182 = vmatpush.msra.mxu2 %v871_v45  ;;  %v903_v40 = vld [vmem:[#allocation8 + $0x610] sm:$0xff]  ;;  %v964_v42 = vld [vmem:[#allocation8 + $0x7f8] sm:$0xff] }
 0x13a   :  { %1243 = vmatpush.msrb.mxu1 %v804_v46  ;;  %v956_v45 = vld [vmem:[#allocation8 + $0x7b8] sm:$0xff] }
 0x13b   :  { %1228 = vmatpush.msrb.mxu0 %v720_v43  ;;  %1183 = vmatpush.msra.mxu2 %v867_v48  ;;  %v960_v43 = vld [vmem:[#allocation8 + $0x7d8] sm:$0xff] }
 0x13c   :  { %1244 = vmatpush.msrb.mxu1 %v800_v49  ;;  %v952_v46 = vld [vmem:[#allocation8 + $0x798] sm:$0xff] }
 0x13d   :  { %1229 = vmatpush.msrb.mxu0 %v716_v47  ;;  %1184 = vmatpush.msra.mxu2 %v863_v51  ;;  %v948_v47 = vld [vmem:[#allocation8 + $0x778] sm:$0xff] }
 0x13e   :  { %1245 = vmatpush.msrb.mxu1 %v796_v52  ;;  %v944_v48 = vld [vmem:[#allocation8 + $0x758] sm:$0xff] }
 0x13f   :  { %1230 = vmatpush.msrb.mxu0 %v712_v50  ;;  %v642_v57 = vpop.f32.mrf.mxu0  ;;  %1185 = vmatpush.msra.mxu2 %v859_v54  ;;  %v940_v49 = vld [vmem:[#allocation8 + $0x738] sm:$0xff] }
 0x140   :  { %1231 = vmatmul.f32.vlgmr.msrb.gmra.mxu0 %v1754_v36  ;;  %v643_v59 = vadd.f32 %v642_v57, %v380_v53  ;;  %1246 = vmatpush.msrb.mxu1 %v792_v55  ;;  %v843_v36 = vld [vmem:[#allocation8 + $0x430] sm:$0xff]  ;;  %v936_v50 = vld [vmem:[#allocation8 + $0x718] sm:$0xff] }
 0x141   :  { %v662_v61 = vpop.f32.mrf.mxu1  ;;  %1186 = vmatpush.msra.mxu2 %v855_v56  ;;  %v932_v51 = vld [vmem:[#allocation8 + $0x6f8] sm:$0xff] }
 0x142   :  { %v663_v63 = vadd.f32 %v662_v61, %v643_v59  ;;  %1247 = vmatpush.msrb.mxu1 %v788_v58  ;;  %v928_v52 = vld [vmem:[#allocation8 + $0x6d8] sm:$0xff]  ;;  %v1311_v61 = vld [vmem:[#allocation11 + $0x60] sm:$0xff] }
 0x143   :  { %v682_v1 = vpop.f32.mrf.mxu2  ;;  %1187 = vmatpush.msra.mxu2 %v851_v60  ;;  %v924_v53 = vld [vmem:[#allocation8 + $0x6b8] sm:$0xff]  ;;  %v1312_v60 = vld [vmem:[#allocation11 + $0x68] sm:$0xff] }
 0x144   :  { %v683_v3 = vadd.f32 %v682_v1, %v663_v63  ;;  %1248 = vmatpush.msrb.mxu1 %v784_v62  ;;  %v916_v54 = vld [vmem:[#allocation8 + $0x678] sm:$0xff] }
 0x145   :  { %v702_v4 = vpop.f32.mrf.mxu3  ;;  %1188 = vmatpush.msra.mxu2 %v847_v0  ;;  %v912_v55 = vld [vmem:[#allocation8 + $0x658] sm:$0xff] }
 0x146   :  { %v703_v6 = vadd.f32 %v702_v4, %v683_v3  ;;  %1249 = vmatpush.msrb.mxu1 %v780_v2  ;;  %v908_v56 = vld [vmem:[#allocation8 + $0x638] sm:$0xff]  ;;  %v1308_v2 = vld [vmem:[#allocation11 + $0x48] sm:$0xff]  ;;  %v1327_v4 = vld [vmem:[#allocation11 + $0xe0] sm:$0xff] }
 0x147   :  { %1189 = vmatpush.msra.mxu2 %v843_v36  ;;  %v904_v57 = vld [vmem:[#allocation8 + $0x618] sm:$0xff]  ;;  %v1328_v3 = vld [vmem:[#allocation11 + $0xe8] sm:$0xff]  ;;  %v1307_v36 = vld [vmem:[#allocation11 + $0x40] sm:$0xff] }
 0x148   :  { %v1772_v8 = vmax.f32 %v703_v6, 0.0  ;;  %1250 = vmatpush.msrb.mxu1 %v776_v5  ;;  %v1314_v58 = vld [vmem:[#allocation11 + $0x78] sm:$0xff]  ;;  %v1313_v59 = vld [vmem:[#allocation11 + $0x70] sm:$0xff] }
 0x149   :  { %1190 = vmatpush.msra.mxu2 %v839_v7  ;;  %1251 = vmatmul.f32.vlgmr.msrb.gmra.mxu1 %v1759_v15  ;;  %v943_v15 = vld [vmem:[#allocation8 + $0x750] sm:$0xff]  ;;  %v1310_v62 = vld [vmem:[#allocation11 + $0x58] sm:$0xff] }
 0x14a   :  { %1051 = vmatmul.f32.vlgmr.msra.gmra.mxu3 %v1772_v8  ;;  %1191 = vmatmul.f32.vlgmr.msra.gmra.mxu2 %v1765_v33  ;;  %v1330_v63 = vld [vmem:[#allocation11 + $0xf8] sm:$0xff]  ;;  %v1309_v0 = vld [vmem:[#allocation11 + $0x50] sm:$0xff] }
 0x14b   :  { %1195 = vmatpush.msra.mxu3 %v963_v9  ;;  %1255 = vmatpush.msrb.mxu2 %v900_v10  ;;  %v1329_v1 = vld [vmem:[#allocation11 + $0xf0] sm:$0xff]  ;;  %v1306_v5 = vld [vmem:[#allocation11 + $0x38] sm:$0xff]  ;;  %v1304_v9 = vld [vmem:[#allocation11 + $0x28] sm:$0xff] }
 0x14c   :  { %1367 = vmatpush.msra.mxu0 %v1314_v58  ;;  %1387 = vmatpush.msra.mxu1 %v1330_v63  ;;  %v1326_v6 = vld [vmem:[#allocation11 + $0xd8] sm:$0xff]  ;;  %v1305_v7 = vld [vmem:[#allocation11 + $0x30] sm:$0xff]  ;;  %v1324_v10 = vld [vmem:[#allocation11 + $0xc8] sm:$0xff] }
 0x14d   :  { %1196 = vmatpush.msra.mxu3 %v959_v11  ;;  %1256 = vmatpush.msrb.mxu2 %v896_v12  ;;  %v1303_v11 = vld [vmem:[#allocation11 + $0x20] sm:$0xff] }
 0x14e   :  { %1368 = vmatpush.msra.mxu0 %v1313_v59  ;;  %1388 = vmatpush.msra.mxu1 %v1329_v1  ;;  %v1323_v12 = vld [vmem:[#allocation11 + $0xc0] sm:$0xff]  ;;  %v1362_v59 = vld [vmem:[#allocation11 + $0x1f8] sm:$0xff] }
 0x14f   :  { %1197 = vmatpush.msra.mxu3 %v955_v13  ;;  %1257 = vmatpush.msrb.mxu2 %v892_v14  ;;  %v1302_v13 = vld [vmem:[#allocation11 + $0x18] sm:$0xff]  ;;  %v1359_v1 = vld [vmem:[#allocation11 + $0x1e0] sm:$0xff] }
 0x150   :  { %1369 = vmatpush.msra.mxu0 %v1312_v60  ;;  %1389 = vmatpush.msra.mxu1 %v1328_v3  ;;  %v1322_v14 = vld [vmem:[#allocation11 + $0xb8] sm:$0xff]  ;;  %v1361_v60 = vld [vmem:[#allocation11 + $0x1f0] sm:$0xff] }
 0x151   :  { %1198 = vmatpush.msra.mxu3 %v951_v16  ;;  %1258 = vmatpush.msrb.mxu2 %v888_v17  ;;  %v1301_v16 = vld [vmem:[#allocation11 + $0x10] sm:$0xff]  ;;  %v1358_v3 = vld [vmem:[#allocation11 + $0x1d8] sm:$0xff] }
 0x152   :  { %1131 = vmatmul.f32.vlgmr.msrb.gmra.mxu3 %v1772_v8  ;;  %1370 = vmatpush.msra.mxu0 %v1311_v61  ;;  %v1321_v17 = vld [vmem:[#allocation11 + $0xb0] sm:$0xff] }
 0x153   :  { %1199 = vmatpush.msra.mxu3 %v947_v18  ;;  %1259 = vmatpush.msrb.mxu2 %v884_v19  ;;  %v1300_v18 = vld [vmem:[#allocation11 + $0x8] sm:$0xff] }
 0x154   :  { %1371 = vmatpush.msra.mxu0 %v1310_v62  ;;  %1390 = vmatpush.msra.mxu1 %v1327_v4  ;;  %v1320_v19 = vld [vmem:[#allocation11 + $0xa8] sm:$0xff] }
 0x155   :  { %1200 = vmatpush.msra.mxu3 %v943_v15  ;;  %1260 = vmatpush.msrb.mxu2 %v880_v20  ;;  %v1299_v15 = vld [vmem:[#allocation11] sm:$0xff]  ;;  %v1360_v62 = vld [vmem:[#allocation11 + $0x1e8] sm:$0xff] }
 0x156   :  { %1372 = vmatpush.msra.mxu0 %v1309_v0  ;;  %1391 = vmatpush.msra.mxu1 %v1326_v6  ;;  %v1319_v20 = vld [vmem:[#allocation11 + $0xa0] sm:$0xff]  ;;  %v1356_v4 = vld [vmem:[#allocation11 + $0x1c8] sm:$0xff]  ;;  %v1354_v6 = vld [vmem:[#allocation11 + $0x1b8] sm:$0xff] }
 0x157   :  { %1201 = vmatpush.msra.mxu3 %v939_v38  ;;  %1261 = vmatpush.msrb.mxu2 %v876_v39  ;;  %v1346_v38 = vld [vmem:[#allocation11 + $0x178] sm:$0xff] }
 0x158   :  { %1373 = vmatpush.msra.mxu0 %v1308_v2  ;;  %v1318_v39 = vld [vmem:[#allocation11 + $0x98] sm:$0xff] }
 0x159   :  { %1202 = vmatpush.msra.mxu3 %v935_v21  ;;  %1262 = vmatpush.msrb.mxu2 %v872_v22  ;;  %v1345_v21 = vld [vmem:[#allocation11 + $0x170] sm:$0xff] }
 0x15a   :  { %1374 = vmatpush.msra.mxu0 %v1307_v36  ;;  %v1317_v22 = vld [vmem:[#allocation11 + $0x90] sm:$0xff] }
 0x15b   :  { %1203 = vmatpush.msra.mxu3 %v931_v23  ;;  %1263 = vmatpush.msrb.mxu2 %v868_v44  ;;  %v1344_v23 = vld [vmem:[#allocation11 + $0x168] sm:$0xff]  ;;  %v1357_v36 = vld [vmem:[#allocation11 + $0x1d0] sm:$0xff] }
 0x15c   :  { %1375 = vmatpush.msra.mxu0 %v1306_v5  ;;  %v1316_v44 = vld [vmem:[#allocation11 + $0x88] sm:$0xff]  ;;  %v1355_v5 = vld [vmem:[#allocation11 + $0x1c0] sm:$0xff] }
 0x15d   :  { %1204 = vmatpush.msra.mxu3 %v927_v24  ;;  %1264 = vmatpush.msrb.mxu2 %v864_v25  ;;  %v1343_v24 = vld [vmem:[#allocation11 + $0x160] sm:$0xff] }
 0x15e   :  { %1376 = vmatpush.msra.mxu0 %v1305_v7  ;;  %v1315_v25 = vld [vmem:[#allocation11 + $0x80] sm:$0xff]  ;;  %v1353_v7 = vld [vmem:[#allocation11 + $0x1b0] sm:$0xff] }
 0x15f   :  { %1205 = vmatpush.msra.mxu3 %v923_v26  ;;  %1265 = vmatpush.msrb.mxu2 %v860_v27  ;;  %v1342_v26 = vld [vmem:[#allocation11 + $0x158] sm:$0xff]  ;;  %v1341_v27 = vld [vmem:[#allocation11 + $0x150] sm:$0xff] }
 0x160   :  { %1377 = vmatpush.msra.mxu0 %v1304_v9  ;;  %v1352_v9 = vld [vmem:[#allocation11 + $0x1a8] sm:$0xff] }
 0x161   :  { %1206 = vmatpush.msra.mxu3 %v919_v28  ;;  %1266 = vmatpush.msrb.mxu2 %v856_v29  ;;  %v1340_v28 = vld [vmem:[#allocation11 + $0x148] sm:$0xff]  ;;  %v1781_v29 = vld [vmem:[#allocation10] sm:$0xf] }
 0x162   :  { %1378 = vmatpush.msra.mxu0 %v1303_v11  ;;  %v1351_v11 = vld [vmem:[#allocation11 + $0x1a0] sm:$0xff] }
 0x163   :  { %1207 = vmatpush.msra.mxu3 %v915_v30  ;;  %1267 = vmatpush.msrb.mxu2 %v852_v31  ;;  %v1339_v30 = vld [vmem:[#allocation11 + $0x140] sm:$0xff]  ;;  %v1338_v31 = vld [vmem:[#allocation11 + $0x138] sm:$0xff] }
 0x164   :  { %1379 = vmatpush.msra.mxu0 %v1302_v13 }
 0x165   :  { %1208 = vmatpush.msra.mxu3 %v911_v32  ;;  %1268 = vmatpush.msrb.mxu2 %v848_v34  ;;  %v967_v32 = vperm.slane %v1781_v29, 0 }
 0x166   :  { %1380 = vmatpush.msra.mxu0 %v1301_v16 }
 0x167   :  { %1209 = vmatpush.msra.mxu3 %v907_v35  ;;  %1269 = vmatpush.msrb.mxu2 %v844_v37  ;;  %v1337_v35 = vld [vmem:[#allocation11 + $0x130] sm:$0xff] }
 0x168   :  { %1381 = vmatpush.msra.mxu0 %v1300_v18 }
 0x169   :  { %1210 = vmatpush.msra.mxu3 %v903_v40  ;;  %1270 = vmatpush.msrb.mxu2 %v840_v41  ;;  %v1336_v40 = vld [vmem:[#allocation11 + $0x128] sm:$0xff] }
 0x16a   :  { %1211 = vmatmul.f32.vlgmr.msra.gmra.mxu3 %v1772_v8  ;;  %1271 = vmatmul.f32.vlgmr.msrb.gmra.mxu2 %v1765_v33  ;;  %v920_v33 = vld [vmem:[#allocation8 + $0x698] sm:$0xff] }
 0x16b   :  { %1275 = vmatpush.msrb.mxu3 %v964_v42  ;;  %1382 = vmatpush.msra.mxu0 %v1299_v15 }
 0x16c   :  { %1407 = vmatpush.msra.mxu2 %v1346_v38  ;;  %v1348_v38 = vld [vmem:[#allocation11 + $0x188] sm:$0xff] }
 0x16d   :  { %1276 = vmatpush.msrb.mxu3 %v960_v43  ;;  %v1335_v43 = vld [vmem:[#allocation11 + $0x120] sm:$0xff] }
 0x16e   :  { %1408 = vmatpush.msra.mxu2 %v1345_v21  ;;  %v1347_v21 = vld [vmem:[#allocation11 + $0x180] sm:$0xff] }
 0x16f   :  { %1277 = vmatpush.msrb.mxu3 %v956_v45  ;;  %v1334_v45 = vld [vmem:[#allocation11 + $0x118] sm:$0xff] }
 0x170   :  { %1409 = vmatpush.msra.mxu2 %v1344_v23 }
 0x171   :  { %1278 = vmatpush.msrb.mxu3 %v952_v46 }
 0x172   :  { %1410 = vmatpush.msra.mxu2 %v1343_v24 }
 0x173   :  { %1279 = vmatpush.msrb.mxu3 %v948_v47  ;;  %v968_v47 = vperm.slane %v1781_v29, 1 }
 0x174   :  { %1411 = vmatpush.msra.mxu2 %v1342_v26 }
 0x175   :  { %1280 = vmatpush.msrb.mxu3 %v944_v48  ;;  %v992_v34 = vpop.f32.mrf.mxu0 }
 0x176   :  { %1412 = vmatpush.msra.mxu2 %v1341_v27  ;;  %v993_v41 = vadd.f32 %v992_v34, %v967_v32  ;;  %v1479_v32 = vld [vmem:[%s1799_s6] ss:$0 sm:$0xff] }
 0x177   :  { %1281 = vmatpush.msrb.mxu3 %v940_v49 }
 0x178   :  { %1413 = vmatpush.msra.mxu2 %v1340_v28 }
 0x179   :  { %1282 = vmatpush.msrb.mxu3 %v936_v50 }
 0x17a   :  { %1414 = vmatpush.msra.mxu2 %v1339_v30 }
 0x17b   :  { %1283 = vmatpush.msrb.mxu3 %v932_v51  ;;  %v1333_v51 = vld [vmem:[#allocation11 + $0x110] sm:$0xff] }
 0x17c   :  { %1415 = vmatpush.msra.mxu2 %v1338_v31 }
 0x17d   :  { %1284 = vmatpush.msrb.mxu3 %v928_v52  ;;  %v1072_v49 = vpop.f32.mrf.mxu0 }
 0x17e   :  { %1416 = vmatpush.msra.mxu2 %v1337_v35 }
 0x17f   :  { %1285 = vmatpush.msrb.mxu3 %v924_v53 }
 0x180   :  { %1417 = vmatpush.msra.mxu2 %v1336_v40 }
 0x181   :  { %1286 = vmatpush.msrb.mxu3 %v920_v33  ;;  %v1332_v33 = vld [vmem:[#allocation11 + $0x108] sm:$0xff] }
 0x182   :  { %1418 = vmatpush.msra.mxu2 %v1335_v43 }
 0x183   :  { %1287 = vmatpush.msrb.mxu3 %v916_v54  ;;  %v1073_v54 = vadd.f32 %v1072_v49, %v968_v47 }
 0x184   :  { %1419 = vmatpush.msra.mxu2 %v1334_v45 }
 0x185   :  { %1288 = vmatpush.msrb.mxu3 %v912_v55  ;;  %v1012_v37 = vpop.f32.mrf.mxu1 }
 0x186   :  { %v1013_v46 = vadd.f32 %v1012_v37, %v993_v41  ;;  %1420 = vmatpush.msra.mxu2 %v1333_v51 }
 0x187   :  { %1289 = vmatpush.msrb.mxu3 %v908_v56  ;;  %v1331_v56 = vld [vmem:[#allocation11 + $0x100] sm:$0xff] }
 0x188   :  { %1421 = vmatpush.msra.mxu2 %v1332_v33 }
 0x189   :  { %1290 = vmatpush.msrb.mxu3 %v904_v57 }
 0x18a   :  { %1291 = vmatmul.f32.vlgmr.msrb.gmra.mxu3 %v1772_v8  ;;  %v1325_v8 = vld [vmem:[#allocation11 + $0xd0] sm:$0xff]  ;;  %1422 = vmatpush.msra.mxu2 %v1331_v56 }
 0x18b   :  { %1392 = vmatpush.msra.mxu1 %v1325_v8  ;;  %1427 = vmatpush.msra.mxu3 %v1362_v59  ;;  %v969_v8 = vperm.slane %v1781_v29, 2 }
 0x18d   :  { %1393 = vmatpush.msra.mxu1 %v1324_v10  ;;  %v1092_v53 = vpop.f32.mrf.mxu1  ;;  %1428 = vmatpush.msra.mxu3 %v1361_v60 }
 0x18e   :  { %v1093_v58 = vadd.f32 %v1092_v53, %v1073_v54 }
 0x18f   :  { %1394 = vmatpush.msra.mxu1 %v1323_v12  ;;  %1429 = vmatpush.msra.mxu3 %v1360_v62 }
 0x191   :  { %1395 = vmatpush.msra.mxu1 %v1322_v14  ;;  %1430 = vmatpush.msra.mxu3 %v1359_v1  ;;  %v1350_v14 = vld [vmem:[#allocation11 + $0x198] sm:$0xff] }
 0x193   :  { %1396 = vmatpush.msra.mxu1 %v1321_v17  ;;  %1431 = vmatpush.msra.mxu3 %v1358_v3 }
 0x195   :  { %1397 = vmatpush.msra.mxu1 %v1320_v19  ;;  %1432 = vmatpush.msra.mxu3 %v1357_v36  ;;  %v1349_v19 = vld [vmem:[#allocation11 + $0x190] sm:$0xff] }
 0x197   :  { %1398 = vmatpush.msra.mxu1 %v1319_v20  ;;  %1433 = vmatpush.msra.mxu3 %v1356_v4 }
 0x199   :  { %1399 = vmatpush.msra.mxu1 %v1318_v39  ;;  %1434 = vmatpush.msra.mxu3 %v1355_v5 }
 0x19b   :  { %1400 = vmatpush.msra.mxu1 %v1317_v22  ;;  %1435 = vmatpush.msra.mxu3 %v1354_v6  ;;  %v970_v22 = vperm.slane %v1781_v29, 3 }
 0x19d   :  { %1401 = vmatpush.msra.mxu1 %v1316_v44  ;;  %v1152_v10 = vpop.f32.mrf.mxu0  ;;  %1436 = vmatpush.msra.mxu3 %v1353_v7 }
 0x19e   :  { %v1153_v13 = vadd.f32 %v1152_v10, %v969_v8 }
 0x19f   :  { %1402 = vmatpush.msra.mxu1 %v1315_v25  ;;  %1437 = vmatpush.msra.mxu3 %v1352_v9 }
 0x1a1   :  { %1438 = vmatpush.msra.mxu3 %v1351_v11 }
 0x1a3   :  { %1439 = vmatpush.msra.mxu3 %v1350_v14 }
 0x1a5   :  { %v1172_v12 = vpop.f32.mrf.mxu1  ;;  %1440 = vmatpush.msra.mxu3 %v1349_v19 }
 0x1a6   :  { %v1173_v17 = vadd.f32 %v1172_v12, %v1153_v13 }
 0x1a7   :  { %1441 = vmatpush.msra.mxu3 %v1348_v38 }
 0x1a9   :  { %1442 = vmatpush.msra.mxu3 %v1347_v21 }
 0x1ad   :  { %v1032_v42 = vpop.f32.mrf.mxu2 }
 0x1ae   :  { %v1033_v48 = vadd.f32 %v1032_v42, %v1013_v46 }
 0x1b5   :  { %v1112_v57 = vpop.f32.mrf.mxu2 }
 0x1b6   :  { %v1113_v61 = vadd.f32 %v1112_v57, %v1093_v58 }
 0x1bd   :  { %v1232_v23 = vpop.f32.mrf.mxu0 }
 0x1be   :  { %v1233_v24 = vadd.f32 %v1232_v23, %v970_v22 }
 0x1c6   :  { %v1252_v44 = vpop.f32.mrf.mxu1 }
 0x1c7   :  { %v1253_v26 = vadd.f32 %v1252_v44, %v1233_v24 }
 0x1cd   :  { %v1052_v50 = vpop.f32.mrf.mxu3  ;;  %v1192_v16 = vpop.f32.mrf.mxu2 }
 0x1ce   :  { %v1053_v52 = vadd.f32 %v1052_v50, %v1033_v48  ;;  %v1193_v18 = vadd.f32 %v1192_v16, %v1173_v17 }
 0x1d0   :  { %v1295_v55 = vmax.f32 %v1053_v52, 0.0 }
 0x1d2   :  { %1383 = vmatmul.f32.vlgmr.msra.gmra.mxu0 %v1295_v55 }
 0x1d5   :  { %v1132_v63 = vpop.f32.mrf.mxu3 }
 0x1d6   :  { %v1133_v0 = vadd.f32 %v1132_v63, %v1113_v61 }
 0x1d8   :  { %v1296_v2 = vmax.f32 %v1133_v0, 0.0 }
 0x1da   :  { %1403 = vmatmul.f32.vlgmr.msra.gmra.mxu1 %v1296_v2 }
 0x1ed   :  { %v1212_v15 = vpop.f32.mrf.mxu3  ;;  %v1272_v25 = vpop.f32.mrf.mxu2 }
 0x1ee   :  { %v1213_v20 = vadd.f32 %v1212_v15, %v1193_v18  ;;  %v1273_v27 = vadd.f32 %v1272_v25, %v1253_v26 }
 0x1f0   :  { %v1297_v39 = vmax.f32 %v1213_v20, 0.0 }
 0x1f2   :  { %1423 = vmatmul.f32.vlgmr.msra.gmra.mxu2 %v1297_v39 }
 0x20d   :  { %v1292_v28 = vpop.f32.mrf.mxu3 }
 0x20e   :  { %v1293_v30 = vadd.f32 %v1292_v28, %v1273_v27 }
 0x210   :  { %v1298_v31 = vmax.f32 %v1293_v30, 0.0 }
 0x212   :  { %1443 = vmatmul.f32.vlgmr.msra.gmra.mxu3 %v1298_v31 }
 0x24f   :  { %v1384_v34 = vpop.f32.mrf.mxu0 }
 0x250   :  { %v1385_v37 = vadd.f32 %v1479_v32, %v1384_v34 }
 0x257   :  { %v1404_v35 = vpop.f32.mrf.mxu1 }
 0x258   :  { %v1405_v41 = vadd.f32 %v1404_v35, %v1385_v37 }
 0x275   :  { %v1424_v40 = vpop.f32.mrf.mxu2 }
 0x276   :  { %v1425_v29 = vadd.f32 %v1424_v40, %v1405_v41 }
 0x295   :  { %v1444_v42 = vpop.f32.mrf.mxu3 }
 0x296   :  { %v1445_v43 = vadd.f32 %v1444_v42, %v1425_v29 }
 0x298   :  { %1447 = vst [vmem:[#allocation13] sm:$0xff] %v1445_v43 }
 0x299   :  { %1458 = dma.vmem_to_hbm [thread:$0]  %s1454_s9, 128, %s1456_s12, [#allocation4]  }
 0x29a   :  { %1656 = dma.done.wait [#allocation4], 128  }
 0x29b   :  { %1657 = vsyncadd [#allocation4], 4294967168 }
 0x29c   :  { %1463 = vsyncpa [#allocation3], 1 }
 0x29d   :  { %1464 = vsyncpa [#allocation6], 1 }
 0x29e   :  { %1465 = vsyncpa [#allocation9], 1 }
 0x29f   :  { %1466 = vsyncpa [#allocation12], 1 }
 0x2a0   :  { %1467 = vsyncpa [#allocation4], 1 }

</bundles_post_ra>
